<compile_context>
chip_gen: v5e
topology: v5e:2x2
jax: 0.10.0
libtpu: 0.0.40
codegen_flags: <defaults>
</compile_context>

<pallas_src>
import jax
import jax.numpy as jnp
from jax.experimental import pallas as pl
from jax.experimental.pallas import tpu as pltpu


def _round_up(n, m):
    return ((n + m - 1) // m) * m


def _make_vae_kernel(D, A, Hp):
    """D: padded input_size, A: padded aux_size, Hp: padded hidden_size."""
    H2 = 2 * Hp
    bf16 = jnp.bfloat16

    def kernel(xe_ref, wa_ref, wb_ref, b_ref, recon_ref, mlv_ref):
        # Packed activation slab (f32): [x | eps]
        x = xe_ref[:, :D]                     # [TB, D]
        eps = xe_ref[:, D:]                   # [TB, Hp]

        # Packed weights (bf16): wa = [w1 ; w3] (rows), wb = [w21|w22 , w4] (cols)
        w1 = wa_ref[:D, :]                    # [D, A]
        w3 = wa_ref[D:, :]                    # [Hp, A]
        wh = wb_ref[:, :H2]                   # [A, 2*Hp]  fused mu/logvar head
        w4 = wb_ref[:, H2:]                   # [A, D]

        # Packed biases (f32): [b1 | b21|b22 | b3 | b4]
        b1 = b_ref[:, :A]
        bh = b_ref[:, A:A + H2]
        b3 = b_ref[:, A + H2:2 * A + H2]
        b4 = b_ref[:, 2 * A + H2:]

        # ---- encode: h1 = relu(fc1(x)) ----
        h1 = jnp.dot(x.astype(bf16), w1, preferred_element_type=jnp.float32) + b1
        h1 = jnp.maximum(h1, 0.0)

        # ---- fused heads: [mu | logvar] = (fc21 | fc22)(h1), one MXU pass ----
        mlv = jnp.dot(h1.astype(bf16), wh, preferred_element_type=jnp.float32) + bh
        mu = mlv[:, :Hp]
        logvar = mlv[:, Hp:]

        # ---- reparameterize: z = mu + eps * exp(0.5 * logvar) (f32, EUP) ----
        z = mu + eps * jnp.exp(0.5 * logvar)

        # ---- decode: recon = sigmoid(fc4(relu(fc3(z)))) ----
        h3 = jnp.dot(z.astype(bf16), w3, preferred_element_type=jnp.float32) + b3
        h3 = jnp.maximum(h3, 0.0)
        logits = jnp.dot(h3.astype(bf16), w4, preferred_element_type=jnp.float32) + b4

        recon_ref[...] = jax.nn.sigmoid(logits).astype(recon_ref.dtype)
        mlv_ref[...] = mlv.astype(mlv_ref.dtype)

    return kernel


def pack_params(params, input_size, aux_size, hidden_size):
    """Pad to lane-dense shapes, fuse the two heads, pack into 3 buffers."""
    D = _round_up(input_size, 128)
    A = _round_up(aux_size, 128)
    Hp = _round_up(hidden_size, 128)
    H2 = 2 * Hp

    def pad2(w, r, c):
        return jnp.pad(w, ((0, r - w.shape[0]), (0, c - w.shape[1])))

    w1 = pad2(params["w1"], D, A)
    w21 = pad2(params["w21"], A, Hp)
    w22 = pad2(params["w22"], A, Hp)
    w3 = pad2(params["w3"], Hp, A)
    w4 = pad2(params["w4"], A, D)

    wa = jnp.concatenate([w1, w3], axis=0).astype(jnp.bfloat16)        # [D+Hp, A]
    wb = jnp.concatenate([jnp.concatenate([w21, w22], axis=1), w4],
                         axis=1).astype(jnp.bfloat16)                  # [A, H2+D]

    biases = jnp.concatenate(
        [pad2(params["b1"], 1, A),
         pad2(params["b21"], 1, Hp), pad2(params["b22"], 1, Hp),
         pad2(params["b3"], 1, A),
         pad2(params["b4"], 1, D)], axis=1).astype(jnp.float32)        # [1, 2A+H2+D]

    return dict(wa=wa, wb=wb, biases=biases, D=D, A=A, Hp=Hp,
                input_size=input_size, hidden_size=hidden_size)


def vae_forward(x_nchw, packed, eps):
    """Forward pass matching VariationalAutoencoder.forward.

    x_nchw: [N, C, H, W] float32
    eps:    [B, hidden_size] standard-normal noise (torch.randn_like(std))
    Returns (recon [B, input_size], mu [B, hidden], logvar [B, hidden]).
    """
    input_size = packed["input_size"]
    hidden = packed["hidden_size"]
    D, A, Hp = packed["D"], packed["A"], packed["Hp"]
    H2 = 2 * Hp

    xf = x_nchw.reshape(-1, input_size).astype(jnp.float32)  # x.view(-1, input_size)
    B = xf.shape[0]

    # Batch tiling: pad to a multiple of the batch tile; mark the axis parallel
    # so big batches shard across both TensorCores on v7x.
    TB = 256 if B >= 256 else _round_up(B, 8)
    Bp = _round_up(B, TB)

    # Single packed activation slab: [x | eps], zero-padded.
    xe = jnp.zeros((Bp, D + Hp), jnp.float32)
    xe = xe.at[:B, :input_size].set(xf)
    xe = xe.at[:B, D:D + hidden].set(eps.astype(jnp.float32))

    kernel = _make_vae_kernel(D, A, Hp)

    recon_p, mlv_p = pl.pallas_call(
        kernel,
        out_shape=(jax.ShapeDtypeStruct((Bp, D), jnp.float32),
                   jax.ShapeDtypeStruct((Bp, H2), jnp.float32)),
        grid=(Bp // TB,),
        in_specs=[
            pl.BlockSpec((TB, D + Hp), lambda i: (i, 0)),           # activations: tiled
            pl.BlockSpec((D + Hp, A), lambda i: (0, 0)),            # weights: resident
            pl.BlockSpec((A, H2 + D), lambda i: (0, 0)),
            pl.BlockSpec((1, 2 * A + H2 + D), lambda i: (0, 0)),    # biases: resident
        ],
        out_specs=(pl.BlockSpec((TB, D), lambda i: (i, 0)),
                   pl.BlockSpec((TB, H2), lambda i: (i, 0))),
        compiler_params=pltpu.CompilerParams(dimension_semantics=("parallel",)),
    )(xe, packed["wa"], packed["wb"], packed["biases"])

    recon = recon_p[:B, :input_size]
    mu = mlv_p[:B, :hidden]
    logvar = mlv_p[:B, Hp:Hp + hidden]
    return recon, mu, logvar


def init_params(key, input_size, aux_size=400, hidden_size=20):
    """Deterministic synthetic parameters (nn.Linear-style init, pre-transposed [in,out])."""
    def linear(k, fan_in, fan_out):
        kw, kb = jax.random.split(k)
        bound = 1.0 / jnp.sqrt(fan_in)
        w = jax.random.uniform(kw, (fan_in, fan_out), jnp.float32, -bound, bound)
        b = jax.random.uniform(kb, (1, fan_out), jnp.float32, -bound, bound)
        return w, b

    k1, k21, k22, k3, k4 = jax.random.split(key, 5)
    w1, b1 = linear(k1, input_size, aux_size)
    w21, b21 = linear(k21, aux_size, hidden_size)
    w22, b22 = linear(k22, aux_size, hidden_size)
    w3, b3 = linear(k3, hidden_size, aux_size)
    w4, b4 = linear(k4, aux_size, input_size)
    return {"w1": w1, "b1": b1, "w21": w21, "b21": b21, "w22": w22, "b22": b22,
            "w3": w3, "b3": b3, "w4": w4, "b4": b4}


if __name__ == "__main__":
    # NCHW input [2, 4, 8, 8] -> input_size = 4*8*8 = 256.
    N, C, H, W = 2, 4, 8, 8
    input_size = C * H * W
    aux_size = 400
    hidden_size = 20

    key = jax.random.PRNGKey(0)
    kx, keps, kp = jax.random.split(key, 3)

    x = jax.random.normal(kx, (N, C, H, W), jnp.float32)
    params = init_params(kp, input_size, aux_size, hidden_size)
    eps = jax.random.normal(keps, (N, hidden_size), jnp.float32)

    packed = pack_params(params, input_size, aux_size, hidden_size)
    recon, mu, logvar = vae_forward(x, packed, eps)
    jax.block_until_ready((recon, mu, logvar))

    # Reference in plain JAX using the same bf16 weight quantization (f32 accum),
    # so the check validates the kernel math rather than the quantization choice.
    def mm(a, w):
        return jnp.dot(a.astype(jnp.bfloat16), w.astype(jnp.bfloat16),
                       preferred_element_type=jnp.float32)

    xf = x.reshape(-1, input_size)
    h1 = jnp.maximum(mm(xf, params["w1"]) + params["b1"], 0.0)
    mu_r = mm(h1, params["w21"]) + params["b21"]
    lv_r = mm(h1, params["w22"]) + params["b22"]
    z = mu_r + eps * jnp.exp(0.5 * lv_r)
    h3 = jnp.maximum(mm(z, params["w3"]) + params["b3"], 0.0)
    recon_r = jax.nn.sigmoid(mm(h3, params["w4"]) + params["b4"])

    assert recon.shape == (N, input_size)
    assert mu.shape == (N, hidden_size) and logvar.shape == (N, hidden_size)
    assert jnp.allclose(recon, recon_r, atol=2e-3)
    assert jnp.allclose(mu, mu_r, atol=2e-3)
    assert jnp.allclose(logvar, lv_r, atol=2e-3)

    print("KERNEL_OK")
</pallas_src>

<mosaic_0001>
module attributes {stable_mosaic.version = 11 : i64} {
  func.func @kernel(%arg0: i32, %arg1: memref<8x384xf32, #tpu.memory_space<vmem>>, %arg2: memref<384x512xbf16, #tpu.memory_space<vmem>>, %arg3: memref<512x512xbf16, #tpu.memory_space<vmem>>, %arg4: memref<1x1536xf32, #tpu.memory_space<vmem>>, %arg5: memref<8x256xf32, #tpu.memory_space<vmem>>, %arg6: memref<8x256xf32, #tpu.memory_space<vmem>>) attributes {dimension_semantics = [#tpu.dimension_semantics<parallel>], iteration_bounds = array<i64: 1>, scalar_prefetch = 0 : i64, scratch_operands = 0 : i64, tpu.core_type = #tpu.core_type<tc>, window_params = [{transform_indices = @transform_0, window_bounds = array<i64: 8, 384>}, {pipeline_mode = #tpu.pipeline_mode<synchronous>, transform_indices = @transform_1, window_bounds = array<i64: 384, 512>}, {pipeline_mode = #tpu.pipeline_mode<synchronous>, transform_indices = @transform_2, window_bounds = array<i64: 512, 512>}, {pipeline_mode = #tpu.pipeline_mode<synchronous>, transform_indices = @transform_3, window_bounds = array<i64: 1, 1536>}, {transform_indices = @transform_4, window_bounds = array<i64: 8, 256>}, {transform_indices = @transform_5, window_bounds = array<i64: 8, 256>}]} {
    %c0 = arith.constant 0 : index
    %c0_0 = arith.constant 0 : index
    %0 = vector.load %arg1[%c0, %c0_0] : memref<8x384xf32, #tpu.memory_space<vmem>>, vector<8x256xf32>
    %c0_1 = arith.constant 0 : index
    %c256 = arith.constant 256 : index
    %1 = vector.load %arg1[%c0_1, %c256] : memref<8x384xf32, #tpu.memory_space<vmem>>, vector<8x128xf32>
    %c0_2 = arith.constant 0 : index
    %c0_3 = arith.constant 0 : index
    %2 = vector.load %arg2[%c0_2, %c0_3] : memref<384x512xbf16, #tpu.memory_space<vmem>>, vector<256x512xbf16>
    %c256_4 = arith.constant 256 : index
    %c0_5 = arith.constant 0 : index
    %3 = vector.load %arg2[%c256_4, %c0_5] : memref<384x512xbf16, #tpu.memory_space<vmem>>, vector<128x512xbf16>
    %c0_6 = arith.constant 0 : index
    %c0_7 = arith.constant 0 : index
    %4 = vector.load %arg3[%c0_6, %c0_7] : memref<512x512xbf16, #tpu.memory_space<vmem>>, vector<512x256xbf16>
    %c0_8 = arith.constant 0 : index
    %c256_9 = arith.constant 256 : index
    %5 = vector.load %arg3[%c0_8, %c256_9] : memref<512x512xbf16, #tpu.memory_space<vmem>>, vector<512x256xbf16>
    %c0_10 = arith.constant 0 : index
    %c0_11 = arith.constant 0 : index
    %6 = vector.load %arg4[%c0_10, %c0_11] : memref<1x1536xf32, #tpu.memory_space<vmem>>, vector<1x512xf32>
    %c0_12 = arith.constant 0 : index
    %c512 = arith.constant 512 : index
    %7 = vector.load %arg4[%c0_12, %c512] : memref<1x1536xf32, #tpu.memory_space<vmem>>, vector<1x256xf32>
    %c0_13 = arith.constant 0 : index
    %c768 = arith.constant 768 : index
    %8 = vector.load %arg4[%c0_13, %c768] : memref<1x1536xf32, #tpu.memory_space<vmem>>, vector<1x512xf32>
    %c0_14 = arith.constant 0 : index
    %c1280 = arith.constant 1280 : index
    %9 = vector.load %arg4[%c0_14, %c1280] : memref<1x1536xf32, #tpu.memory_space<vmem>>, vector<1x256xf32>
    %10 = arith.truncf %0 : vector<8x256xf32> to vector<8x256xbf16>
    %cst = arith.constant dense<0.000000e+00> : vector<8x512xf32>
    %11 = tpu.matmul %10, %2, %cst {dimension_numbers = #tpu.dot_dimension_numbers<[1], [0], [0], [1], [0, 0, 1, 1], [], []>} : vector<8x256xbf16>, vector<256x512xbf16>, vector<8x512xf32> -> vector<8x512xf32>
    %12 = vector.broadcast %6 : vector<1x512xf32> to vector<8x512xf32>
    %13 = arith.addf %11, %12 : vector<8x512xf32>
    %cst_15 = arith.constant 0.000000e+00 : f32
    %14 = vector.broadcast %cst_15 : f32 to vector<8x512xf32>
    %15 = arith.maximumf %13, %14 : vector<8x512xf32>
    %16 = arith.truncf %15 : vector<8x512xf32> to vector<8x512xbf16>
    %cst_16 = arith.constant dense<0.000000e+00> : vector<8x256xf32>
    %17 = tpu.matmul %16, %4, %cst_16 {dimension_numbers = #tpu.dot_dimension_numbers<[1], [0], [0], [1], [0, 0, 1, 1], [], []>} : vector<8x512xbf16>, vector<512x256xbf16>, vector<8x256xf32> -> vector<8x256xf32>
    %18 = vector.broadcast %7 : vector<1x256xf32> to vector<8x256xf32>
    %19 = arith.addf %17, %18 : vector<8x256xf32>
    %20 = vector.extract_strided_slice %19 {offsets = [0, 0], sizes = [8, 128], strides = [1, 1]} : vector<8x256xf32> to vector<8x128xf32>
    %21 = vector.extract_strided_slice %19 {offsets = [0, 128], sizes = [8, 128], strides = [1, 1]} : vector<8x256xf32> to vector<8x128xf32>
    %cst_17 = arith.constant 5.000000e-01 : f32
    %22 = vector.broadcast %cst_17 : f32 to vector<8x128xf32>
    %23 = arith.mulf %22, %21 : vector<8x128xf32>
    %24 = math.exp %23 : vector<8x128xf32>
    %25 = arith.mulf %1, %24 : vector<8x128xf32>
    %26 = arith.addf %20, %25 : vector<8x128xf32>
    %27 = arith.truncf %26 : vector<8x128xf32> to vector<8x128xbf16>
    %cst_18 = arith.constant dense<0.000000e+00> : vector<8x512xf32>
    %28 = tpu.matmul %27, %3, %cst_18 {dimension_numbers = #tpu.dot_dimension_numbers<[1], [0], [0], [1], [0, 0, 1, 1], [], []>} : vector<8x128xbf16>, vector<128x512xbf16>, vector<8x512xf32> -> vector<8x512xf32>
    %29 = vector.broadcast %8 : vector<1x512xf32> to vector<8x512xf32>
    %30 = arith.addf %28, %29 : vector<8x512xf32>
    %cst_19 = arith.constant 0.000000e+00 : f32
    %31 = vector.broadcast %cst_19 : f32 to vector<8x512xf32>
    %32 = arith.maximumf %30, %31 : vector<8x512xf32>
    %33 = arith.truncf %32 : vector<8x512xf32> to vector<8x512xbf16>
    %cst_20 = arith.constant dense<0.000000e+00> : vector<8x256xf32>
    %34 = tpu.matmul %33, %5, %cst_20 {dimension_numbers = #tpu.dot_dimension_numbers<[1], [0], [0], [1], [0, 0, 1, 1], [], []>} : vector<8x512xbf16>, vector<512x256xbf16>, vector<8x256xf32> -> vector<8x256xf32>
    %35 = vector.broadcast %9 : vector<1x256xf32> to vector<8x256xf32>
    %36 = arith.addf %34, %35 : vector<8x256xf32>
    %37 = arith.negf %36 : vector<8x256xf32>
    %38 = math.exp %37 : vector<8x256xf32>
    %cst_21 = arith.constant 1.000000e+00 : f32
    %39 = vector.broadcast %cst_21 : f32 to vector<8x256xf32>
    %40 = arith.addf %39, %38 : vector<8x256xf32>
    %41 = arith.divf %39, %40 : vector<8x256xf32>
    %c0_22 = arith.constant 0 : index
    %c0_23 = arith.constant 0 : index
    %42 = vector.load %arg5[%c0_22, %c0_23] : memref<8x256xf32, #tpu.memory_space<vmem>>, vector<8x256xf32>
    tpu.vector_store %arg5[%c0_22, %c0_23], %41 {strides = array<i32>} : memref<8x256xf32, #tpu.memory_space<vmem>>, vector<8x256xf32>,
    %c0_24 = arith.constant 0 : index
    %c0_25 = arith.constant 0 : index
    %43 = vector.load %arg6[%c0_24, %c0_25] : memref<8x256xf32, #tpu.memory_space<vmem>>, vector<8x256xf32>
    tpu.vector_store %arg6[%c0_24, %c0_25], %19 {strides = array<i32>} : memref<8x256xf32, #tpu.memory_space<vmem>>, vector<8x256xf32>,
    return
  }
  func.func @transform_0(%arg0: i32) -> (i32, i32) {
    %c0_i32 = arith.constant 0 : i32
    %c0_i32_0 = arith.constant 0 : i32
    return %arg0, %c0_i32 : i32, i32
  }
  func.func @transform_1(%arg0: i32) -> (i32, i32) {
    %c0_i32 = arith.constant 0 : i32
    %c0_i32_0 = arith.constant 0 : i32
    %c0_i32_1 = arith.constant 0 : i32
    return %c0_i32, %c0_i32_0 : i32, i32
  }
  func.func @transform_2(%arg0: i32) -> (i32, i32) {
    %c0_i32 = arith.constant 0 : i32
    %c0_i32_0 = arith.constant 0 : i32
    %c0_i32_1 = arith.constant 0 : i32
    return %c0_i32, %c0_i32_0 : i32, i32
  }
  func.func @transform_3(%arg0: i32) -> (i32, i32) {
    %c0_i32 = arith.constant 0 : i32
    %c0_i32_0 = arith.constant 0 : i32
    %c0_i32_1 = arith.constant 0 : i32
    return %c0_i32, %c0_i32_0 : i32, i32
  }
  func.func @transform_4(%arg0: i32) -> (i32, i32) {
    %c0_i32 = arith.constant 0 : i32
    %c0_i32_0 = arith.constant 0 : i32
    return %arg0, %c0_i32 : i32, i32
  }
  func.func @transform_5(%arg0: i32) -> (i32, i32) {
    %c0_i32 = arith.constant 0 : i32
    %c0_i32_0 = arith.constant 0 : i32
    return %arg0, %c0_i32 : i32, i32
  }
}

</mosaic_0001>

<bundles_post_ra>
// kernel: tpu_custom_call.1
= control target key start
LH: loop header
LB: loop body
LE: loop exit
PB: predicated region body
PF: predicated region fallthrough
CT: control target
= control target key end

     0   :  { %11 = vsyncpa [#allocation3], 0  ;;  %s3312_s0 = inlined_call_operand.hbm [shape: f32[8,384], index: 0, kind: input, shape index: {}]   ;;  %s3313_s1 = inlined_call_operand.hbm [shape: bf16[384,512], index: 1, kind: input, shape index: {}]   ;;  %s3314_s2 = inlined_call_operand.hbm [shape: bf16[512,512], index: 2, kind: input, shape index: {}]   ;;  %s3315_s3 = inlined_call_operand.hbm [shape: f32[1,1536], index: 3, kind: input, shape index: {}]   ;;  %s3316_s4 = inlined_call_operand.hbm [shape: f32[8,256], index: 4, kind: output, shape index: {0}]   ;;  %s3317_s5 = inlined_call_operand.hbm [shape: f32[8,256], index: 5, kind: output, shape index: {1}]  }
   0x1   :  { %12 = vsyncpa [#allocation6], 0 }
   0x2   :  { %13 = vsyncpa [#allocation9], 0 }
   0x3   :  { %14 = vsyncpa [#allocation4], 0  ;;  %s31_s20 = sshll.u32 %s3313_s1, 4  ;;  %s32_s20 = int_to_ptr.hbm [resolvable:$true] %s31_s20 }
   0x4   :  { %15 = vsyncpa [#allocation12], 0  ;;  %s3218_s21 = smov [#allocation5]   ;;  %s21_s25 = sshll.u32 %s3312_s0, 4  ;;  %s22_s25 = int_to_ptr.hbm [resolvable:$true] %s21_s25 }
   0x5   :  { %s33_s22 = sshll.u32 %s3218_s21, 4  ;;  %s3219_s26 = smov 256   ;;  %s34_s22 = int_to_ptr.vmem [resolvable:$true] %s33_s22 }
   0x6   :  { %s3220_s27 = smov 16   ;;  %s3221_s28 = smov [#allocation2]  }
   0x7   :  { %39 = dma.hbm_to_vmem [thread:$0]  %s32_s20, 12288, %s34_s22, [#allocation6], %s3219_s26, %s3219_s26, %s3220_s27  }
   0x8   :  { %s23_s29 = sshll.u32 %s3221_s28, 4  ;;  %s44_s7 = sshll.u32 %s3314_s2, 4  ;;  %s24_s29 = int_to_ptr.vmem [resolvable:$true] %s23_s29  ;;  %s45_s7 = int_to_ptr.hbm [resolvable:$true] %s44_s7 }
   0x9   :  { %26 = dma.hbm_to_vmem [thread:$0]  %s22_s25, 384, %s24_s29, [#allocation3]  }
   0xa   :  { %s58_s9 = sshll.u32 %s3315_s3, 4  ;;  %s3222_s10 = smov [#allocation7]   ;;  %s59_s9 = int_to_ptr.hbm [resolvable:$true] %s58_s9 }
   0xb   :  { %s46_s11 = sshll.u32 %s3222_s10, 4  ;;  %s3223_s0 = smov [#allocation8]   ;;  %s47_s11 = int_to_ptr.vmem [resolvable:$true] %s46_s11 }
   0xc   :  { %52 = dma.hbm_to_vmem [thread:$0]  %s45_s7, 16384, %s47_s11, [#allocation6], %s3219_s26, %s3219_s26, %s3220_s27  }
   0xd   :  { %s60_s12 = sshll.u32 %s3223_s0, 4  ;;  %s61_s12 = int_to_ptr.vmem [resolvable:$true] %s60_s12 }
   0xe   :  { %63 = dma.hbm_to_vmem [thread:$0]  %s59_s9, 192, %s61_s12, [#allocation9]  }
   0xf   :  { %3208 = dma.done.wait [#allocation3], 384  }
  0x10   :  { %3209 = vsyncadd [#allocation3], 4294966912 }
  0x11   :  { %3210 = dma.done.wait [#allocation6], 28672  }
  0x12   :  { %3211 = vsyncadd [#allocation6], 4294938624 }
  0x13   :  { %3212 = dma.done.wait [#allocation9], 192  }
  0x14   :  { %3213 = vsyncadd [#allocation9], 4294967104  ;;  %v2038_v0 = vld [vmem:[#allocation5 + $0xe0] sm:$0xf]  ;;  %v2852_v1 = vld [vmem:[#allocation5 + $0xec] sm:$0xf0] }
  0x15   :  { %v2166_v2 = vld [vmem:[#allocation5 + $0x1e0] sm:$0xf]  ;;  %v2039_v3 = vor.u32 %v2852_v1, %v2038_v0  ;;  %v2884_v4 = vld [vmem:[#allocation5 + $0x1ec] sm:$0xf0]  ;;  %v2850_v5 = vld [vmem:[#allocation5 + $0xe4] sm:$0xf] }
  0x16   :  { %v2040_v6 = vld [vmem:[#allocation5 + $0xf0] sm:$0xf0]  ;;  %v2167_v7 = vor.u32 %v2884_v4, %v2166_v2  ;;  %v2882_v9 = vld [vmem:[#allocation5 + $0x1e4] sm:$0xf]  ;;  %v2022_v11 = vld [vmem:[#allocation5 + $0xc0] sm:$0xf] }
  0x17   :  { %v2043_v8 = vor.u32 %v2850_v5, %v2040_v6  ;;  %v2168_v10 = vld [vmem:[#allocation5 + $0x1f0] sm:$0xf0]  ;;  %642 = vmatpush.bf16.msra.mxu0 %v2039_v3  ;;  %v2848_v13 = vld [vmem:[#allocation5 + $0xcc] sm:$0xf0]  ;;  %v2150_v14 = vld [vmem:[#allocation5 + $0x1c0] sm:$0xf] }
  0x18   :  { %v2171_v12 = vor.u32 %v2882_v9, %v2168_v10  ;;  %v2880_v15 = vld [vmem:[#allocation5 + $0x1cc] sm:$0xf0]  ;;  %655 = vmatpush.bf16.msra.mxu1 %v2167_v7  ;;  %v2023_v16 = vor.u32 %v2848_v13, %v2022_v11  ;;  %v2846_v18 = vld [vmem:[#allocation5 + $0xc4] sm:$0xf]  ;;  %v2024_v19 = vld [vmem:[#allocation5 + $0xd0] sm:$0xf0] }
  0x19   :  { %668 = vmatpush.bf16.msra.mxu2 %v2043_v8  ;;  %v2151_v17 = vor.u32 %v2880_v15, %v2150_v14  ;;  %v2878_v20 = vld [vmem:[#allocation5 + $0x1c4] sm:$0xf]  ;;  %v2027_v21 = vor.u32 %v2846_v18, %v2024_v19  ;;  %v2152_v22 = vld [vmem:[#allocation5 + $0x1d0] sm:$0xf0]  ;;  %v2006_v23 = vld [vmem:[#allocation5 + $0xa0] sm:$0xf] }
  0x1a   :  { %681 = vmatpush.bf16.msra.mxu3 %v2171_v12  ;;  %v2844_v24 = vld [vmem:[#allocation5 + $0xac] sm:$0xf0]  ;;  %v2155_v25 = vor.u32 %v2878_v20, %v2152_v22  ;;  %v2134_v26 = vld [vmem:[#allocation5 + $0x1a0] sm:$0xf]  ;;  %v2842_v28 = vld [vmem:[#allocation5 + $0xa4] sm:$0xf] }
  0x1b   :  { %v2876_v27 = vld [vmem:[#allocation5 + $0x1ac] sm:$0xf0]  ;;  %643 = vmatpush.bf16.msra.mxu0 %v2023_v16  ;;  %v2007_v29 = vor.u32 %v2844_v24, %v2006_v23  ;;  %v2008_v30 = vld [vmem:[#allocation5 + $0xb0] sm:$0xf0]  ;;  %v2874_v31 = vld [vmem:[#allocation5 + $0x1a4] sm:$0xf] }
  0x1c   :  { %v2136_v32 = vld [vmem:[#allocation5 + $0x1b0] sm:$0xf0]  ;;  %656 = vmatpush.bf16.msra.mxu1 %v2151_v17  ;;  %v2135_v33 = vor.u32 %v2876_v27, %v2134_v26  ;;  %v2011_v34 = vor.u32 %v2842_v28, %v2008_v30  ;;  %v1990_v35 = vld [vmem:[#allocation5 + $0x80] sm:$0xf]  ;;  %v2840_v36 = vld [vmem:[#allocation5 + $0x8c] sm:$0xf0] }
  0x1d   :  { %669 = vmatpush.bf16.msra.mxu2 %v2027_v21  ;;  %v2118_v37 = vld [vmem:[#allocation5 + $0x180] sm:$0xf]  ;;  %v2139_v38 = vor.u32 %v2874_v31, %v2136_v32  ;;  %v2872_v39 = vld [vmem:[#allocation5 + $0x18c] sm:$0xf0]  ;;  %v2838_v40 = vld [vmem:[#allocation5 + $0x84] sm:$0xf]  ;;  %v1991_v44 = vor.u32 %v2840_v36, %v1990_v35 }
  0x1e   :  { %682 = vmatpush.bf16.msra.mxu3 %v2155_v25  ;;  %v1992_v41 = vld [vmem:[#allocation5 + $0x90] sm:$0xf0]  ;;  %v2870_v42 = vld [vmem:[#allocation5 + $0x184] sm:$0xf]  ;;  %v2119_v45 = vor.u32 %v2872_v39, %v2118_v37  ;;  %v1974_v47 = vld [vmem:[#allocation5 + $0x60] sm:$0xf] }
  0x1f   :  { %v2120_v43 = vld [vmem:[#allocation5 + $0x190] sm:$0xf0]  ;;  %644 = vmatpush.bf16.msra.mxu0 %v2007_v29  ;;  %v1995_v46 = vor.u32 %v2838_v40, %v1992_v41  ;;  %v2836_v48 = vld [vmem:[#allocation5 + $0x6c] sm:$0xf0]  ;;  %v2102_v49 = vld [vmem:[#allocation5 + $0x160] sm:$0xf] }
  0x20   :  { %657 = vmatpush.bf16.msra.mxu1 %v2135_v33  ;;  %v2123_v50 = vor.u32 %v2870_v42, %v2120_v43  ;;  %v2868_v51 = vld [vmem:[#allocation5 + $0x16c] sm:$0xf0]  ;;  %v2834_v52 = vld [vmem:[#allocation5 + $0x64] sm:$0xf]  ;;  %v1976_v53 = vld [vmem:[#allocation5 + $0x70] sm:$0xf0]  ;;  %v1975_v56 = vor.u32 %v2836_v48, %v1974_v47 }
  0x21   :  { %670 = vmatpush.bf16.msra.mxu2 %v2011_v34  ;;  %v2866_v54 = vld [vmem:[#allocation5 + $0x164] sm:$0xf]  ;;  %v2104_v55 = vld [vmem:[#allocation5 + $0x170] sm:$0xf0]  ;;  %v2103_v57 = vor.u32 %v2868_v51, %v2102_v49  ;;  %v1979_v58 = vor.u32 %v2834_v52, %v1976_v53  ;;  %v1958_v59 = vld [vmem:[#allocation5 + $0x40] sm:$0xf] }
  0x22   :  { %683 = vmatpush.bf16.msra.mxu3 %v2139_v38  ;;  %v2832_v60 = vld [vmem:[#allocation5 + $0x4c] sm:$0xf0]  ;;  %v2086_v61 = vld [vmem:[#allocation5 + $0x140] sm:$0xf]  ;;  %v2107_v62 = vor.u32 %v2866_v54, %v2104_v55  ;;  %v2830_v0 = vld [vmem:[#allocation5 + $0x44] sm:$0xf] }
  0x23   :  { %645 = vmatpush.bf16.msra.mxu0 %v1991_v44  ;;  %v2864_v63 = vld [vmem:[#allocation5 + $0x14c] sm:$0xf0]  ;;  %v1960_v1 = vld [vmem:[#allocation5 + $0x50] sm:$0xf0]  ;;  %v2862_v2 = vld [vmem:[#allocation5 + $0x144] sm:$0xf]  ;;  %v1959_v4 = vor.u32 %v2832_v60, %v1958_v59 }
  0x24   :  { %658 = vmatpush.bf16.msra.mxu1 %v2119_v45  ;;  %v2088_v3 = vld [vmem:[#allocation5 + $0x150] sm:$0xf0]  ;;  %v2087_v5 = vor.u32 %v2864_v63, %v2086_v61  ;;  %v1963_v6 = vor.u32 %v2830_v0, %v1960_v1  ;;  %v1942_v7 = vld [vmem:[#allocation5 + $0x20] sm:$0xf]  ;;  %v2828_v8 = vld [vmem:[#allocation5 + $0x2c] sm:$0xf0] }
  0x25   :  { %671 = vmatpush.bf16.msra.mxu2 %v1995_v46  ;;  %v2070_v9 = vld [vmem:[#allocation5 + $0x120] sm:$0xf]  ;;  %v2091_v10 = vor.u32 %v2862_v2, %v2088_v3  ;;  %v2860_v11 = vld [vmem:[#allocation5 + $0x12c] sm:$0xf0]  ;;  %v2826_v12 = vld [vmem:[#allocation5 + $0x24] sm:$0xf]  ;;  %v1943_v16 = vor.u32 %v2828_v8, %v1942_v7 }
  0x26   :  { %684 = vmatpush.bf16.msra.mxu3 %v2123_v50  ;;  %v1944_v13 = vld [vmem:[#allocation5 + $0x30] sm:$0xf0]  ;;  %v2858_v14 = vld [vmem:[#allocation5 + $0x124] sm:$0xf]  ;;  %v1926_v17 = vld [vmem:[#allocation5] sm:$0xf]  ;;  %v2071_v19 = vor.u32 %v2860_v11, %v2070_v9 }
  0x27   :  { %646 = vmatpush.bf16.msra.mxu0 %v1975_v56  ;;  %v2072_v15 = vld [vmem:[#allocation5 + $0x130] sm:$0xf0]  ;;  %v2824_v18 = vld [vmem:[#allocation5 + $0xc] sm:$0xf0]  ;;  %v1947_v20 = vor.u32 %v2826_v12, %v1944_v13  ;;  %v2054_v21 = vld [vmem:[#allocation5 + $0x100] sm:$0xf] }
  0x28   :  { %659 = vmatpush.bf16.msra.mxu1 %v2103_v57  ;;  %v2856_v22 = vld [vmem:[#allocation5 + $0x10c] sm:$0xf0]  ;;  %v2822_v23 = vld [vmem:[#allocation5 + $0x4] sm:$0xf]  ;;  %v2075_v24 = vor.u32 %v2858_v14, %v2072_v15  ;;  %v1928_v25 = vld [vmem:[#allocation5 + $0x10] sm:$0xf0]  ;;  %v1927_v31 = vor.u32 %v2824_v18, %v1926_v17 }
  0x29   :  { %672 = vmatpush.bf16.msra.mxu2 %v1979_v58  ;;  %v2854_v26 = vld [vmem:[#allocation5 + $0x104] sm:$0xf]  ;;  %v2056_v27 = vld [vmem:[#allocation5 + $0x110] sm:$0xf0]  ;;  %v2046_v28 = vld [vmem:[#allocation5 + $0xe8] sm:$0xf]  ;;  %v2055_v35 = vor.u32 %v2856_v22, %v2054_v21  ;;  %v1931_v36 = vor.u32 %v2822_v23, %v1928_v25 }
  0x2a   :  { %685 = vmatpush.bf16.msra.mxu3 %v2107_v62  ;;  %v2853_v29 = vld [vmem:[#allocation5 + $0xf4] sm:$0xf0]  ;;  %v2174_v30 = vld [vmem:[#allocation5 + $0x1e8] sm:$0xf]  ;;  %v2851_v33 = vld [vmem:[#allocation5 + $0xec] sm:$0xf]  ;;  %v2059_v40 = vor.u32 %v2854_v26, %v2056_v27 }
  0x2b   :  { %647 = vmatpush.bf16.msra.mxu0 %v1959_v4  ;;  %v2885_v32 = vld [vmem:[#allocation5 + $0x1f4] sm:$0xf0]  ;;  %v2048_v34 = vld [vmem:[#allocation5 + $0xf8] sm:$0xf0]  ;;  %v2883_v37 = vld [vmem:[#allocation5 + $0x1ec] sm:$0xf]  ;;  %v2047_v41 = vor.u32 %v2853_v29, %v2046_v28 }
  0x2c   :  { %660 = vmatpush.bf16.msra.mxu1 %v2087_v5  ;;  %v2176_v38 = vld [vmem:[#allocation5 + $0x1f8] sm:$0xf0]  ;;  %v80_v39 = vld [vmem:[#allocation2] sm:$0xff]  ;;  %v81_v42 = vld [vmem:[#allocation2 + $0x8] sm:$0xff]  ;;  %v2175_v43 = vor.u32 %v2885_v32, %v2174_v30  ;;  %v2051_v44 = vor.u32 %v2851_v33, %v2048_v34  ;;  %s3224_s2 = smov [#allocation11]   ;;  %s1907_s15 = sshll.u32 %s3317_s5, 4  ;;  %s1908_s15 = int_to_ptr.hbm [resolvable:$true] %s1907_s15 }
  0x2d   :  { %673 = vmatpush.bf16.msra.mxu2 %v1963_v6  ;;  %v2030_v45 = vld [vmem:[#allocation5 + $0xc8] sm:$0xf]  ;;  %v2849_v46 = vld [vmem:[#allocation5 + $0xd4] sm:$0xf0]  ;;  %v2179_v48 = vor.u32 %v2883_v37, %v2176_v38  ;;  %v3268_v49 = vpack.c.bf16 %v80_v39, %v80_v39  ;;  %v2847_v51 = vld [vmem:[#allocation5 + $0xcc] sm:$0xf]  ;;  %v3270_v53 = vpack.c.bf16 %v81_v42, %v81_v42 }
  0x2e   :  { %686 = vmatpush.bf16.msra.mxu3 %v2091_v10  ;;  %v2158_v47 = vld [vmem:[#allocation5 + $0x1c8] sm:$0xf]  ;;  %v2881_v50 = vld [vmem:[#allocation5 + $0x1d4] sm:$0xf0]  ;;  %v2032_v52 = vld [vmem:[#allocation5 + $0xd8] sm:$0xf0]  ;;  %v2031_v56 = vor.u32 %v2849_v46, %v2030_v45 }
  0x2f   :  { %648 = vmatpush.bf16.msra.mxu0 %v1943_v16  ;;  %v2879_v54 = vld [vmem:[#allocation5 + $0x1cc] sm:$0xf]  ;;  %v2160_v55 = vld [vmem:[#allocation5 + $0x1d8] sm:$0xf0]  ;;  %v2159_v57 = vor.u32 %v2881_v50, %v2158_v47  ;;  %v2035_v58 = vor.u32 %v2847_v51, %v2032_v52  ;;  %v2014_v59 = vld [vmem:[#allocation5 + $0xa8] sm:$0xf] }
  0x30   :  { %661 = vmatpush.bf16.msra.mxu1 %v2071_v19  ;;  %v2845_v60 = vld [vmem:[#allocation5 + $0xb4] sm:$0xf0]  ;;  %v2142_v61 = vld [vmem:[#allocation5 + $0x1a8] sm:$0xf]  ;;  %v2163_v62 = vor.u32 %v2879_v54, %v2160_v55  ;;  %v2843_v0 = vld [vmem:[#allocation5 + $0xac] sm:$0xf] }
  0x31   :  { %674 = vmatpush.bf16.msra.mxu2 %v1947_v20  ;;  %v2877_v63 = vld [vmem:[#allocation5 + $0x1b4] sm:$0xf0]  ;;  %v2016_v1 = vld [vmem:[#allocation5 + $0xb8] sm:$0xf0]  ;;  %v2875_v2 = vld [vmem:[#allocation5 + $0x1ac] sm:$0xf]  ;;  %v2015_v4 = vor.u32 %v2845_v60, %v2014_v59 }
  0x32   :  { %687 = vmatpush.bf16.msra.mxu3 %v2075_v24  ;;  %v2144_v3 = vld [vmem:[#allocation5 + $0x1b8] sm:$0xf0]  ;;  %v2143_v5 = vor.u32 %v2877_v63, %v2142_v61  ;;  %v2019_v6 = vor.u32 %v2843_v0, %v2016_v1  ;;  %v1998_v7 = vld [vmem:[#allocation5 + $0x88] sm:$0xf]  ;;  %v2841_v8 = vld [vmem:[#allocation5 + $0x94] sm:$0xf0] }
  0x33   :  { %649 = vmatpush.bf16.msra.mxu0 %v1927_v31  ;;  %v2126_v9 = vld [vmem:[#allocation5 + $0x188] sm:$0xf]  ;;  %v2147_v10 = vor.u32 %v2875_v2, %v2144_v3  ;;  %v2873_v11 = vld [vmem:[#allocation5 + $0x194] sm:$0xf0]  ;;  %v2839_v12 = vld [vmem:[#allocation5 + $0x8c] sm:$0xf]  ;;  %v1999_v16 = vor.u32 %v2841_v8, %v1998_v7 }
  0x34   :  { %662 = vmatpush.bf16.msra.mxu1 %v2055_v35  ;;  %v2000_v13 = vld [vmem:[#allocation5 + $0x98] sm:$0xf0]  ;;  %v2871_v14 = vld [vmem:[#allocation5 + $0x18c] sm:$0xf]  ;;  %v2127_v17 = vor.u32 %v2873_v11, %v2126_v9  ;;  %v1982_v19 = vld [vmem:[#allocation5 + $0x68] sm:$0xf] }
  0x35   :  { %675 = vmatpush.bf16.msra.mxu2 %v1931_v36  ;;  %v2128_v15 = vld [vmem:[#allocation5 + $0x198] sm:$0xf0]  ;;  %v2003_v18 = vor.u32 %v2839_v12, %v2000_v13  ;;  %v2837_v20 = vld [vmem:[#allocation5 + $0x74] sm:$0xf0]  ;;  %v2110_v21 = vld [vmem:[#allocation5 + $0x168] sm:$0xf] }
  0x36   :  { %688 = vmatpush.bf16.msra.mxu3 %v2059_v40  ;;  %650 = vmatmul.bf16.vlgmr.msra.gmra.mxu0 %v3268_v49  ;;  %v2131_v22 = vor.u32 %v2871_v14, %v2128_v15  ;;  %v2869_v23 = vld [vmem:[#allocation5 + $0x174] sm:$0xf0]  ;;  %v2835_v24 = vld [vmem:[#allocation5 + $0x6c] sm:$0xf]  ;;  %v1984_v25 = vld [vmem:[#allocation5 + $0x78] sm:$0xf0]  ;;  %v1983_v28 = vor.u32 %v2837_v20, %v1982_v19 }
  0x37   :  { %694 = vmatpush.bf16.msrb.mxu0 %v2047_v41  ;;  %663 = vmatmul.bf16.vlgmr.msra.gmra.mxu1 %v3270_v53  ;;  %v2867_v26 = vld [vmem:[#allocation5 + $0x16c] sm:$0xf]  ;;  %v2112_v27 = vld [vmem:[#allocation5 + $0x178] sm:$0xf0]  ;;  %v2111_v29 = vor.u32 %v2869_v23, %v2110_v21  ;;  %v1987_v30 = vor.u32 %v2835_v24, %v1984_v25  ;;  %v1966_v31 = vld [vmem:[#allocation5 + $0x48] sm:$0xf] }
  0x38   :  { %707 = vmatpush.bf16.msrb.mxu1 %v2175_v43  ;;  %676 = vmatmul.bf16.vlgmr.msra.gmra.mxu2 %v3268_v49  ;;  %v2833_v32 = vld [vmem:[#allocation5 + $0x54] sm:$0xf0]  ;;  %v2094_v33 = vld [vmem:[#allocation5 + $0x148] sm:$0xf]  ;;  %v2115_v34 = vor.u32 %v2867_v26, %v2112_v27  ;;  %v2831_v36 = vld [vmem:[#allocation5 + $0x4c] sm:$0xf] }
  0x39   :  { %720 = vmatpush.bf16.msrb.mxu2 %v2051_v44  ;;  %689 = vmatmul.bf16.vlgmr.msra.gmra.mxu3 %v3270_v53  ;;  %v2865_v35 = vld [vmem:[#allocation5 + $0x154] sm:$0xf0]  ;;  %v1968_v37 = vld [vmem:[#allocation5 + $0x58] sm:$0xf0]  ;;  %v2863_v38 = vld [vmem:[#allocation5 + $0x14c] sm:$0xf]  ;;  %v1967_v40 = vor.u32 %v2833_v32, %v1966_v31 }
  0x3a   :  { %733 = vmatpush.bf16.msrb.mxu3 %v2179_v48  ;;  %v2096_v39 = vld [vmem:[#allocation5 + $0x158] sm:$0xf0]  ;;  %v2095_v41 = vor.u32 %v2865_v35, %v2094_v33  ;;  %v1971_v42 = vor.u32 %v2831_v36, %v1968_v37  ;;  %v1950_v43 = vld [vmem:[#allocation5 + $0x28] sm:$0xf]  ;;  %v2829_v44 = vld [vmem:[#allocation5 + $0x34] sm:$0xf0] }
  0x3b   :  { %695 = vmatpush.bf16.msrb.mxu0 %v2031_v56  ;;  %v2078_v45 = vld [vmem:[#allocation5 + $0x128] sm:$0xf]  ;;  %v2099_v46 = vor.u32 %v2863_v38, %v2096_v39  ;;  %v2861_v47 = vld [vmem:[#allocation5 + $0x134] sm:$0xf0]  ;;  %v2827_v48 = vld [vmem:[#allocation5 + $0x2c] sm:$0xf]  ;;  %v1951_v54 = vor.u32 %v2829_v44, %v1950_v43 }
  0x3c   :  { %708 = vmatpush.bf16.msrb.mxu1 %v2159_v57  ;;  %v1952_v50 = vld [vmem:[#allocation5 + $0x38] sm:$0xf0]  ;;  %v2859_v51 = vld [vmem:[#allocation5 + $0x12c] sm:$0xf]  ;;  %v1934_v55 = vld [vmem:[#allocation5 + $0x8] sm:$0xf]  ;;  %v2079_v56 = vor.u32 %v2861_v47, %v2078_v45 }
  0x3d   :  { %721 = vmatpush.bf16.msrb.mxu2 %v2035_v58  ;;  %v2080_v52 = vld [vmem:[#allocation5 + $0x138] sm:$0xf0]  ;;  %v1955_v57 = vor.u32 %v2827_v48, %v1952_v50  ;;  %v2825_v58 = vld [vmem:[#allocation5 + $0x14] sm:$0xf0]  ;;  %v2062_v59 = vld [vmem:[#allocation5 + $0x108] sm:$0xf] }
  0x3e   :  { %734 = vmatpush.bf16.msrb.mxu3 %v2163_v62  ;;  %v2857_v60 = vld [vmem:[#allocation5 + $0x114] sm:$0xf0]  ;;  %v2083_v61 = vor.u32 %v2859_v51, %v2080_v52  ;;  %v2823_v62 = vld [vmem:[#allocation5 + $0xc] sm:$0xf]  ;;  %v1936_v63 = vld [vmem:[#allocation5 + $0x18] sm:$0xf0] }
  0x3f   :  { %696 = vmatpush.bf16.msrb.mxu0 %v2015_v4  ;;  %v2855_v0 = vld [vmem:[#allocation5 + $0x10c] sm:$0xf]  ;;  %v2064_v1 = vld [vmem:[#allocation5 + $0x118] sm:$0xf0]  ;;  %v2238_v2 = vld [vmem:[#allocation7 + $0xe0] sm:$0xf]  ;;  %v1935_v4 = vor.u32 %v2825_v58, %v1934_v55  ;;  %v2063_v7 = vor.u32 %v2857_v60, %v2062_v59  ;;  %v1939_v8 = vor.u32 %v2823_v62, %v1936_v63 }
  0x40   :  { %709 = vmatpush.bf16.msrb.mxu1 %v2143_v5  ;;  %v2933_v3 = vld [vmem:[#allocation7 + $0xec] sm:$0xf0]  ;;  %v2302_v5 = vld [vmem:[#allocation7 + $0x1e0] sm:$0xf]  ;;  %v2067_v9 = vor.u32 %v2855_v0, %v2064_v1  ;;  %v2932_v55 = vld [vmem:[#allocation7 + $0xe4] sm:$0xf] }
  0x41   :  { %722 = vmatpush.bf16.msrb.mxu2 %v2019_v6  ;;  %v2949_v6 = vld [vmem:[#allocation7 + $0x1ec] sm:$0xf0]  ;;  %v2366_v11 = vld [vmem:[#allocation7 + $0x2e0] sm:$0xf]  ;;  %v2930_v63 = vld [vmem:[#allocation7 + $0xc4] sm:$0xf] }
  0x42   :  { %735 = vmatpush.bf16.msrb.mxu3 %v2147_v10  ;;  %v2239_v10 = vor.u32 %v2933_v3, %v2238_v2  ;;  %v2965_v12 = vld [vmem:[#allocation7 + $0x2ec] sm:$0xf0]  ;;  %v2230_v13 = vld [vmem:[#allocation7 + $0xc0] sm:$0xf]  ;;  %v2303_v15 = vor.u32 %v2949_v6, %v2302_v5  ;;  %v2232_v0 = vld [vmem:[#allocation7 + $0xd0] sm:$0xf0] }
  0x43   :  { %697 = vmatpush.bf16.msrb.mxu0 %v1999_v16  ;;  %v2931_v14 = vld [vmem:[#allocation7 + $0xcc] sm:$0xf0]  ;;  %v2294_v16 = vld [vmem:[#allocation7 + $0x1c0] sm:$0xf]  ;;  %v2235_v1 = vor.u32 %v2930_v63, %v2232_v0  ;;  %v2304_v6 = vld [vmem:[#allocation7 + $0x1f0] sm:$0xf0] }
  0x44   :  { %710 = vmatpush.bf16.msrb.mxu1 %v2127_v17  ;;  %v2947_v17 = vld [vmem:[#allocation7 + $0x1cc] sm:$0xf0]  ;;  %v2231_v19 = vor.u32 %v2931_v14, %v2230_v13  ;;  %v2358_v20 = vld [vmem:[#allocation7 + $0x2c0] sm:$0xf]  ;;  %v2938_v0 = vld [vmem:[#allocation7 + $0x144] sm:$0xf] }
  0x45   :  { %723 = vmatpush.bf16.msrb.mxu2 %v2003_v18  ;;  %v2367_v18 = vor.u32 %v2965_v12, %v2366_v11  ;;  %v2963_v21 = vld [vmem:[#allocation7 + $0x2cc] sm:$0xf0]  ;;  %v2295_v24 = vor.u32 %v2947_v17, %v2294_v16  ;;  %v2286_v25 = vld [vmem:[#allocation7 + $0x1a0] sm:$0xf]  ;;  %v2224_v12 = vld [vmem:[#allocation7 + $0xb0] sm:$0xf0] }
  0x46   :  { %736 = vmatpush.bf16.msrb.mxu3 %v2131_v22  ;;  %v2222_v22 = vld [vmem:[#allocation7 + $0xa0] sm:$0xf]  ;;  %v2929_v23 = vld [vmem:[#allocation7 + $0xac] sm:$0xf0]  ;;  %v2359_v27 = vor.u32 %v2963_v21, %v2358_v20  ;;  %v2946_v16 = vld [vmem:[#allocation7 + $0x1c4] sm:$0xf] }
  0x47   :  { %698 = vmatpush.bf16.msrb.mxu0 %v1983_v28  ;;  %v2945_v26 = vld [vmem:[#allocation7 + $0x1ac] sm:$0xf0]  ;;  %v2223_v28 = vor.u32 %v2929_v23, %v2222_v22  ;;  %v2278_v32 = vld [vmem:[#allocation7 + $0x180] sm:$0xf]  ;;  %v2926_v22 = vld [vmem:[#allocation7 + $0x84] sm:$0xf] }
  0x48   :  { %711 = vmatpush.bf16.msrb.mxu1 %v2111_v29  ;;  %v2214_v29 = vld [vmem:[#allocation7 + $0x80] sm:$0xf]  ;;  %v2287_v31 = vor.u32 %v2945_v26, %v2286_v25  ;;  %v2943_v33 = vld [vmem:[#allocation7 + $0x18c] sm:$0xf0]  ;;  %s1905_s3 = sshll.u32 %s3224_s2, 4  ;;  %s3225_s5 = smov [#allocation10]   ;;  %s1906_s3 = int_to_ptr.vmem [resolvable:$true] %s1905_s3 }
  0x49   :  { %724 = vmatpush.bf16.msrb.mxu2 %v1987_v30  ;;  %v2927_v30 = vld [vmem:[#allocation7 + $0x8c] sm:$0xf0]  ;;  %v2206_v35 = vld [vmem:[#allocation7 + $0x60] sm:$0xf]  ;;  %v2279_v36 = vor.u32 %v2943_v33, %v2278_v32  ;;  %s1894_s16 = sshll.u32 %s3225_s5, 4  ;;  %s1896_s19 = sshll.u32 %s3316_s4, 4  ;;  %s1895_s16 = int_to_ptr.vmem [resolvable:$true] %s1894_s16  ;;  %s1897_s19 = int_to_ptr.hbm [resolvable:$true] %s1896_s19 }
  0x4a   :  { %737 = vmatpush.bf16.msrb.mxu3 %v2115_v34  ;;  %v2215_v34 = vor.u32 %v2927_v30, %v2214_v29  ;;  %v2270_v37 = vld [vmem:[#allocation7 + $0x160] sm:$0xf]  ;;  %v2941_v38 = vld [vmem:[#allocation7 + $0x16c] sm:$0xf0]  ;;  %v2944_v29 = vld [vmem:[#allocation7 + $0x1a4] sm:$0xf] }
  0x4b   :  { %699 = vmatpush.bf16.msrb.mxu0 %v1967_v40  ;;  %v2198_v39 = vld [vmem:[#allocation7 + $0x40] sm:$0xf]  ;;  %v2923_v40 = vld [vmem:[#allocation7 + $0x4c] sm:$0xf0]  ;;  %v2288_v30 = vld [vmem:[#allocation7 + $0x1b0] sm:$0xf0] }
  0x4c   :  { %712 = vmatpush.bf16.msrb.mxu1 %v2095_v41  ;;  %v2271_v41 = vor.u32 %v2941_v38, %v2270_v37  ;;  %v2939_v43 = vld [vmem:[#allocation7 + $0x14c] sm:$0xf0]  ;;  %v2199_v44 = vor.u32 %v2923_v40, %v2198_v39  ;;  %v2190_v45 = vld [vmem:[#allocation7 + $0x20] sm:$0xf]  ;;  %v2280_v40 = vld [vmem:[#allocation7 + $0x190] sm:$0xf0] }
  0x4d   :  { %725 = vmatpush.bf16.msrb.mxu2 %v1971_v42  ;;  %v2262_v42 = vld [vmem:[#allocation7 + $0x140] sm:$0xf]  ;;  %v2937_v50 = vld [vmem:[#allocation7 + $0x12c] sm:$0xf0] }
  0x4e   :  { %738 = vmatpush.bf16.msrb.mxu3 %v2099_v46  ;;  %v2921_v46 = vld [vmem:[#allocation7 + $0x2c] sm:$0xf0]  ;;  %v2263_v47 = vor.u32 %v2939_v43, %v2262_v42  ;;  %v2254_v48 = vld [vmem:[#allocation7 + $0x120] sm:$0xf] }
  0x4f   :  { %700 = vmatpush.bf16.msrb.mxu0 %v1951_v54  ;;  %v2191_v51 = vor.u32 %v2921_v46, %v2190_v45  ;;  %v2182_v52 = vld [vmem:[#allocation7] sm:$0xf]  ;;  %v2919_v54 = vld [vmem:[#allocation7 + $0xc] sm:$0xf0]  ;;  %v2200_v46 = vld [vmem:[#allocation7 + $0x50] sm:$0xf0] }
  0x50   :  { %713 = vmatpush.bf16.msrb.mxu1 %v2079_v56  ;;  %v2255_v56 = vor.u32 %v2937_v50, %v2254_v48  ;;  %v2246_v58 = vld [vmem:[#allocation7 + $0x100] sm:$0xf]  ;;  %v2935_v59 = vld [vmem:[#allocation7 + $0x10c] sm:$0xf0]  ;;  %v2183_v60 = vor.u32 %v2919_v54, %v2182_v52  ;;  %v2272_v54 = vld [vmem:[#allocation7 + $0x170] sm:$0xf0] }
  0x51   :  { %726 = vmatpush.bf16.msrb.mxu2 %v1955_v57  ;;  %v2240_v57 = vld [vmem:[#allocation7 + $0xf0] sm:$0xf0]  ;;  %v2247_v62 = vor.u32 %v2935_v59, %v2246_v58  ;;  %v2430_v2 = vld [vmem:[#allocation7 + $0x3e0] sm:$0xf]  ;;  %v2981_v3 = vld [vmem:[#allocation7 + $0x3ec] sm:$0xf0] }
  0x52   :  { %739 = vmatpush.bf16.msrb.mxu3 %v2083_v61  ;;  %v2243_v61 = vor.u32 %v2932_v55, %v2240_v57  ;;  %v2431_v5 = vor.u32 %v2981_v3, %v2430_v2  ;;  %v2422_v14 = vld [vmem:[#allocation7 + $0x3c0] sm:$0xf]  ;;  %v2959_v21 = vld [vmem:[#allocation7 + $0x28c] sm:$0xf0]  ;;  %v2920_v59 = vld [vmem:[#allocation7 + $0x24] sm:$0xf] }
  0x53   :  { %701 = vmatpush.bf16.msrb.mxu0 %v1935_v4  ;;  %v2948_v4 = vld [vmem:[#allocation7 + $0x1e4] sm:$0xf]  ;;  %v2342_v20 = vld [vmem:[#allocation7 + $0x280] sm:$0xf]  ;;  %v2957_v33 = vld [vmem:[#allocation7 + $0x26c] sm:$0xf0] }
  0x54   :  { %714 = vmatpush.bf16.msrb.mxu1 %v2063_v7  ;;  %v2307_v7 = vor.u32 %v2948_v4, %v2304_v6  ;;  %v2343_v23 = vor.u32 %v2959_v21, %v2342_v20  ;;  %v2414_v26 = vld [vmem:[#allocation7 + $0x3a0] sm:$0xf]  ;;  %v2975_v38 = vld [vmem:[#allocation7 + $0x38c] sm:$0xf0]  ;;  %v2918_v6 = vld [vmem:[#allocation7 + $0x4] sm:$0xf] }
  0x55   :  { %727 = vmatpush.bf16.msrb.mxu2 %v1939_v8  ;;  %v2350_v8 = vld [vmem:[#allocation7 + $0x2a0] sm:$0xf]  ;;  %v2955_v43 = vld [vmem:[#allocation7 + $0x24c] sm:$0xf0]  ;;  %v2962_v20 = vld [vmem:[#allocation7 + $0x2c4] sm:$0xf] }
  0x56   :  { %740 = vmatpush.bf16.msrb.mxu3 %v2067_v9  ;;  %702 = vmatmul.bf16.vlgmr.msrb.gmra.mxu0 %v3268_v49  ;;  %v2961_v9 = vld [vmem:[#allocation7 + $0x2ac] sm:$0xf0]  ;;  %v2334_v32 = vld [vmem:[#allocation7 + $0x260] sm:$0xf]  ;;  %v2360_v21 = vld [vmem:[#allocation7 + $0x2d0] sm:$0xf0] }
  0x57   :  { %1079 = vmatpush.bf16.msra.mxu0 %v2239_v10  ;;  %715 = vmatmul.bf16.vlgmr.msrb.gmra.mxu1 %v3270_v53  ;;  %v2928_v10 = vld [vmem:[#allocation7 + $0xa4] sm:$0xf]  ;;  %v2351_v11 = vor.u32 %v2961_v9, %v2350_v8  ;;  %v2406_v37 = vld [vmem:[#allocation7 + $0x380] sm:$0xf]  ;;  %v2973_v50 = vld [vmem:[#allocation7 + $0x36c] sm:$0xf0] }
  0x58   :  { %1092 = vmatpush.bf16.msra.mxu1 %v2303_v15  ;;  %728 = vmatmul.bf16.vlgmr.msrb.gmra.mxu2 %v3268_v49  ;;  %v2925_v49 = vld [vmem:[#allocation7 + $0x6c] sm:$0xf0]  ;;  %v2227_v13 = vor.u32 %v2928_v10, %v2224_v12  ;;  %v2407_v39 = vor.u32 %v2975_v38, %v2406_v37  ;;  %v2326_v42 = vld [vmem:[#allocation7 + $0x240] sm:$0xf]  ;;  %v2184_v8 = vld [vmem:[#allocation7 + $0x10] sm:$0xf0] }
  0x59   :  { %741 = vmatmul.bf16.vlgmr.msrb.gmra.mxu3 %v3270_v53  ;;  %1105 = vmatpush.bf16.msra.mxu2 %v2367_v18  ;;  %v2207_v53 = vor.u32 %v2925_v49, %v2206_v35  ;;  %v2979_v15 = vld [vmem:[#allocation7 + $0x3cc] sm:$0xf0]  ;;  %v2296_v18 = vld [vmem:[#allocation7 + $0x1d0] sm:$0xf0]  ;;  %v2335_v35 = vor.u32 %v2957_v33, %v2334_v32  ;;  %v2327_v45 = vor.u32 %v2955_v43, %v2326_v42  ;;  %v2398_v48 = vld [vmem:[#allocation7 + $0x360] sm:$0xf] }
  0x5a   :  { %1118 = vmatpush.bf16.msra.mxu3 %v2431_v5  ;;  %v2423_v17 = vor.u32 %v2979_v15, %v2422_v14  ;;  %v2208_v49 = vld [vmem:[#allocation7 + $0x70] sm:$0xf0]  ;;  %v2399_v52 = vor.u32 %v2973_v50, %v2398_v48  ;;  %v2318_v55 = vld [vmem:[#allocation7 + $0x220] sm:$0xf]  ;;  %v2971_v63 = vld [vmem:[#allocation7 + $0x34c] sm:$0xf0] }
  0x5b   :  { %1080 = vmatpush.bf16.msra.mxu0 %v2231_v19  ;;  %v2299_v19 = vor.u32 %v2946_v16, %v2296_v18  ;;  %v2310_v4 = vld [vmem:[#allocation7 + $0x200] sm:$0xf]  ;;  %v2951_v5 = vld [vmem:[#allocation7 + $0x20c] sm:$0xf0]  ;;  %v2964_v9 = vld [vmem:[#allocation7 + $0x2e4] sm:$0xf] }
  0x5c   :  { %1093 = vmatpush.bf16.msra.mxu1 %v2295_v24  ;;  %v2216_v24 = vld [vmem:[#allocation7 + $0x90] sm:$0xf0]  ;;  %v2969_v14 = vld [vmem:[#allocation7 + $0x32c] sm:$0xf0]  ;;  %v2936_v15 = vld [vmem:[#allocation7 + $0x124] sm:$0xf] }
  0x5d   :  { %1106 = vmatpush.bf16.msra.mxu2 %v2359_v27  ;;  %v2219_v25 = vor.u32 %v2926_v22, %v2216_v24  ;;  %v2977_v27 = vld [vmem:[#allocation7 + $0x3ac] sm:$0xf0]  ;;  %v2368_v10 = vld [vmem:[#allocation7 + $0x2f0] sm:$0xf0]  ;;  %v2374_v22 = vld [vmem:[#allocation7 + $0x300] sm:$0xf] }
  0x5e   :  { %1119 = vmatpush.bf16.msra.mxu3 %v2423_v17  ;;  %v2371_v12 = vor.u32 %v2964_v9, %v2368_v10  ;;  %v2256_v17 = vld [vmem:[#allocation7 + $0x130] sm:$0xf0]  ;;  %v2967_v24 = vld [vmem:[#allocation7 + $0x30c] sm:$0xf0]  ;;  %v2960_v33 = vld [vmem:[#allocation7 + $0x2a4] sm:$0xf] }
  0x5f   :  { %1081 = vmatpush.bf16.msra.mxu0 %v2223_v28  ;;  %v2415_v28 = vor.u32 %v2977_v27, %v2414_v26  ;;  %v2259_v18 = vor.u32 %v2936_v15, %v2256_v17  ;;  %v2248_v26 = vld [vmem:[#allocation7 + $0x110] sm:$0xf0]  ;;  %v2375_v27 = vor.u32 %v2967_v24, %v2374_v22  ;;  %v2956_v50 = vld [vmem:[#allocation7 + $0x264] sm:$0xf] }
  0x60   :  { %1094 = vmatpush.bf16.msra.mxu1 %v2287_v31  ;;  %v2291_v31 = vor.u32 %v2944_v29, %v2288_v30  ;;  %v2980_v29 = vld [vmem:[#allocation7 + $0x3e4] sm:$0xf]  ;;  %v2432_v30 = vld [vmem:[#allocation7 + $0x3f0] sm:$0xf0] }
  0x61   :  { %1107 = vmatpush.bf16.msra.mxu2 %v2351_v11  ;;  %v2187_v11 = vor.u32 %v2918_v6, %v2184_v8  ;;  %v2435_v32 = vor.u32 %v2980_v29, %v2432_v30  ;;  %v2424_v37 = vld [vmem:[#allocation7 + $0x3d0] sm:$0xf0]  ;;  %v2970_v9 = vld [vmem:[#allocation7 + $0x344] sm:$0xf] }
  0x62   :  { %1120 = vmatpush.bf16.msra.mxu3 %v2415_v28  ;;  %v2320_v8 = vld [vmem:[#allocation7 + $0x230] sm:$0xf0] }
  0x63   :  { %1082 = vmatpush.bf16.msra.mxu0 %v2215_v34  ;;  %v2924_v34 = vld [vmem:[#allocation7 + $0x64] sm:$0xf]  ;;  %v2376_v24 = vld [vmem:[#allocation7 + $0x310] sm:$0xf0] }
  0x64   :  { %1095 = vmatpush.bf16.msra.mxu1 %v2279_v36  ;;  %v2211_v36 = vor.u32 %v2924_v34, %v2208_v49  ;;  %v2352_v34 = vld [vmem:[#allocation7 + $0x2b0] sm:$0xf0] }
  0x65   :  { %1108 = vmatpush.bf16.msra.mxu2 %v2343_v23  ;;  %v2363_v23 = vor.u32 %v2962_v20, %v2360_v21  ;;  %v2384_v20 = vld [vmem:[#allocation7 + $0x330] sm:$0xf0] }
  0x66   :  { %1121 = vmatpush.bf16.msra.mxu3 %v2407_v39 }
  0x67   :  { %1083 = vmatpush.bf16.msra.mxu0 %v2207_v53  ;;  %v2942_v53 = vld [vmem:[#allocation7 + $0x184] sm:$0xf] }
  0x68   :  { %1096 = vmatpush.bf16.msra.mxu1 %v2271_v41  ;;  %v2283_v41 = vor.u32 %v2942_v53, %v2280_v40  ;;  %v2958_v40 = vld [vmem:[#allocation7 + $0x284] sm:$0xf] }
  0x69   :  { %1109 = vmatpush.bf16.msra.mxu2 %v2335_v35  ;;  %v2355_v35 = vor.u32 %v2960_v33, %v2352_v34 }
  0x6a   :  { %1122 = vmatpush.bf16.msra.mxu3 %v2399_v52 }
  0x6b   :  { %1084 = vmatpush.bf16.msra.mxu0 %v2199_v44  ;;  %v2922_v44 = vld [vmem:[#allocation7 + $0x44] sm:$0xf] }
  0x6c   :  { %1097 = vmatpush.bf16.msra.mxu1 %v2263_v47  ;;  %v2203_v47 = vor.u32 %v2922_v44, %v2200_v46  ;;  %v2416_v46 = vld [vmem:[#allocation7 + $0x3b0] sm:$0xf0] }
  0x6d   :  { %1110 = vmatpush.bf16.msra.mxu2 %v2327_v45  ;;  %v2976_v45 = vld [vmem:[#allocation7 + $0x3a4] sm:$0xf] }
  0x6e   :  { %v2419_v48 = vor.u32 %v2976_v45, %v2416_v46  ;;  %v2916_v45 = vld [vmem:[#allocation5 + $0x2ec] sm:$0xf0]  ;;  %v2914_v46 = vld [vmem:[#allocation5 + $0x2e4] sm:$0xf] }
  0x6f   :  { %1085 = vmatpush.bf16.msra.mxu0 %v2191_v51  ;;  %v2940_v51 = vld [vmem:[#allocation7 + $0x164] sm:$0xf] }
  0x70   :  { %1098 = vmatpush.bf16.msra.mxu1 %v2255_v56  ;;  %v2953_v56 = vld [vmem:[#allocation7 + $0x22c] sm:$0xf0]  ;;  %v2275_v57 = vor.u32 %v2940_v51, %v2272_v54  ;;  %v2336_v51 = vld [vmem:[#allocation7 + $0x270] sm:$0xf0] }
  0x71   :  { %v2319_v58 = vor.u32 %v2953_v56, %v2318_v55  ;;  %v2339_v55 = vor.u32 %v2956_v50, %v2336_v51  ;;  %v2558_v50 = vld [vmem:[#allocation5 + $0x2e8] sm:$0xf]  ;;  %v2917_v51 = vld [vmem:[#allocation5 + $0x2f4] sm:$0xf0] }
  0x73   :  { %1086 = vmatpush.bf16.msra.mxu0 %v2183_v60  ;;  %v2192_v60 = vld [vmem:[#allocation7 + $0x30] sm:$0xf0]  ;;  %1111 = vmatpush.bf16.msra.mxu2 %v2319_v58 }
  0x74   :  { %1099 = vmatpush.bf16.msra.mxu1 %v2247_v62  ;;  %v2195_v62 = vor.u32 %v2920_v59, %v2192_v60  ;;  %v2974_v59 = vld [vmem:[#allocation7 + $0x384] sm:$0xf]  ;;  %v2408_v60 = vld [vmem:[#allocation7 + $0x390] sm:$0xf0] }
  0x77   :  { %1131 = vmatpush.bf16.msrb.mxu0 %v2243_v61  ;;  %v2390_v61 = vld [vmem:[#allocation7 + $0x340] sm:$0xf] }
  0x78   :  { %1144 = vmatpush.bf16.msrb.mxu1 %v2307_v7  ;;  %v2391_v2 = vor.u32 %v2971_v63, %v2390_v61  ;;  %v2311_v7 = vor.u32 %v2951_v5, %v2310_v4  ;;  %v2972_v4 = vld [vmem:[#allocation7 + $0x364] sm:$0xf]  ;;  %v2400_v5 = vld [vmem:[#allocation7 + $0x370] sm:$0xf0] }
  0x79   :  { %v2403_v6 = vor.u32 %v2972_v4, %v2400_v5  ;;  %v2911_v5 = vld [vmem:[#allocation5 + $0x2cc] sm:$0xf] }
  0x7a   :  { %1123 = vmatpush.bf16.msra.mxu3 %v2391_v2  ;;  %1112 = vmatpush.bf16.msra.mxu2 %v2311_v7  ;;  %v2952_v7 = vld [vmem:[#allocation7 + $0x224] sm:$0xf] }
  0x7b   :  { %1132 = vmatpush.bf16.msrb.mxu0 %v2235_v1  ;;  %v2264_v1 = vld [vmem:[#allocation7 + $0x150] sm:$0xf0] }
  0x7c   :  { %1145 = vmatpush.bf16.msrb.mxu1 %v2299_v19  ;;  %v2267_v3 = vor.u32 %v2938_v0, %v2264_v1  ;;  %v3280_v19 = vld [vmem:[#allocation8] sm:$0xf]  ;;  %v2954_v0 = vld [vmem:[#allocation7 + $0x244] sm:$0xf]  ;;  %v2328_v1 = vld [vmem:[#allocation7 + $0x250] sm:$0xf0] }
  0x7d   :  { %v315_v44 = vperm.slane %v3280_v19, 1  ;;  %v2331_v2 = vor.u32 %v2954_v0, %v2328_v1  ;;  %v2536_v0 = vld [vmem:[#allocation5 + $0x2d0] sm:$0xf0]  ;;  %v2542_v1 = vld [vmem:[#allocation5 + $0x2c8] sm:$0xf] }
  0x7e   :  { %1157 = vmatpush.bf16.msrb.mxu2 %v2371_v12  ;;  %v2392_v12 = vld [vmem:[#allocation7 + $0x350] sm:$0xf0] }
  0x7f   :  { %1133 = vmatpush.bf16.msrb.mxu0 %v2227_v13  ;;  %v2382_v13 = vld [vmem:[#allocation7 + $0x320] sm:$0xf] }
  0x80   :  { %1146 = vmatpush.bf16.msrb.mxu1 %v2291_v31  ;;  %v2383_v16 = vor.u32 %v2969_v14, %v2382_v13  ;;  %v314_v31 = vperm.slane %v3280_v19, 0  ;;  %v2950_v13 = vld [vmem:[#allocation7 + $0x204] sm:$0xf]  ;;  %v2312_v14 = vld [vmem:[#allocation7 + $0x210] sm:$0xf0] }
  0x81   :  { %v2315_v21 = vor.u32 %v2950_v13, %v2312_v14  ;;  %v2526_v13 = vld [vmem:[#allocation5 + $0x2a8] sm:$0xf]  ;;  %v2909_v14 = vld [vmem:[#allocation5 + $0x2b4] sm:$0xf0] }
  0x82   :  { %1124 = vmatpush.bf16.msra.mxu3 %v2383_v16  ;;  %1158 = vmatpush.bf16.msrb.mxu2 %v2363_v23  ;;  %v2395_v16 = vor.u32 %v2970_v9, %v2392_v12  ;;  %v2966_v23 = vld [vmem:[#allocation7 + $0x304] sm:$0xf]  ;;  %v2908_v9 = vld [vmem:[#allocation5 + $0x2ac] sm:$0xf0]  ;;  %v2520_v12 = vld [vmem:[#allocation5 + $0x2b0] sm:$0xf0] }
  0x83   :  { %1134 = vmatpush.bf16.msrb.mxu0 %v2219_v25  ;;  %v2934_v25 = vld [vmem:[#allocation7 + $0x104] sm:$0xf] }
  0x84   :  { %1147 = vmatpush.bf16.msrb.mxu1 %v2283_v41  ;;  %v2251_v28 = vor.u32 %v2934_v25, %v2248_v26  ;;  %v2344_v41 = vld [vmem:[#allocation7 + $0x290] sm:$0xf0]  ;;  %v2379_v25 = vor.u32 %v2966_v23, %v2376_v24  ;;  %v316_v26 = vperm.slane %v3280_v19, 2  ;;  %v2502_v23 = vld [vmem:[#allocation5 + $0x280] sm:$0xf] }
  0x85   :  { %v2347_v43 = vor.u32 %v2958_v40, %v2344_v41  ;;  %v2904_v24 = vld [vmem:[#allocation5 + $0x28c] sm:$0xf0] }
  0x86   :  { %1125 = vmatpush.bf16.msra.mxu3 %v2375_v27  ;;  %1159 = vmatpush.bf16.msrb.mxu2 %v2355_v35 }
  0x87   :  { %1135 = vmatpush.bf16.msrb.mxu0 %v2211_v36  ;;  %v2978_v36 = vld [vmem:[#allocation7 + $0x3c4] sm:$0xf] }
  0x88   :  { %1148 = vmatpush.bf16.msrb.mxu1 %v2275_v57  ;;  %v2427_v39 = vor.u32 %v2978_v36, %v2424_v37 }
  0x8a   :  { %1170 = vmatpush.bf16.msrb.mxu3 %v2435_v32  ;;  %1160 = vmatpush.bf16.msrb.mxu2 %v2347_v43 }
  0x8b   :  { %1136 = vmatpush.bf16.msrb.mxu0 %v2203_v47 }
  0x8c   :  { %1149 = vmatpush.bf16.msrb.mxu1 %v2267_v3 }
  0x8e   :  { %1171 = vmatpush.bf16.msrb.mxu3 %v2427_v39  ;;  %1161 = vmatpush.bf16.msrb.mxu2 %v2339_v55  ;;  %v2559_v55 = vor.u32 %v2917_v51, %v2558_v50  ;;  %v2470_v50 = vld [vmem:[#allocation5 + $0x240] sm:$0xf]  ;;  %v2896_v51 = vld [vmem:[#allocation5 + $0x24c] sm:$0xf0] }
  0x8f   :  { %1137 = vmatpush.bf16.msrb.mxu0 %v2195_v62  ;;  %v2411_v62 = vor.u32 %v2974_v59, %v2408_v60  ;;  %v2534_v60 = vld [vmem:[#allocation5 + $0x2c0] sm:$0xf] }
  0x90   :  { %1150 = vmatpush.bf16.msrb.mxu1 %v2259_v18  ;;  %v2968_v18 = vld [vmem:[#allocation7 + $0x324] sm:$0xf] }
  0x91   :  { %v2387_v22 = vor.u32 %v2968_v18, %v2384_v20  ;;  %v2528_v18 = vld [vmem:[#allocation5 + $0x2b8] sm:$0xf0] }
  0x92   :  { %1172 = vmatpush.bf16.msrb.mxu3 %v2419_v48  ;;  %1162 = vmatpush.bf16.msrb.mxu2 %v2331_v2  ;;  %v2552_v48 = vld [vmem:[#allocation5 + $0x2f0] sm:$0xf0]  ;;  %v2913_v2 = vld [vmem:[#allocation5 + $0x2d4] sm:$0xf0] }
  0x93   :  { %1138 = vmatpush.bf16.msrb.mxu0 %v2187_v11  ;;  %v2323_v11 = vor.u32 %v2952_v7, %v2320_v8  ;;  %v2543_v4 = vor.u32 %v2913_v2, %v2542_v1  ;;  %v2518_v8 = vld [vmem:[#allocation5 + $0x2a0] sm:$0xf] }
  0x94   :  { %1151 = vmatpush.bf16.msrb.mxu1 %v2251_v28  ;;  %v2454_v1 = vld [vmem:[#allocation5 + $0x220] sm:$0xf] }
  0x96   :  { %1173 = vmatpush.bf16.msrb.mxu3 %v2411_v62  ;;  %1163 = vmatpush.bf16.msrb.mxu2 %v2323_v11  ;;  %v2910_v62 = vld [vmem:[#allocation5 + $0x2c4] sm:$0xf]  ;;  %v2519_v11 = vor.u32 %v2908_v9, %v2518_v8  ;;  %v2462_v8 = vld [vmem:[#allocation5 + $0x228] sm:$0xf]  ;;  %v2893_v9 = vld [vmem:[#allocation5 + $0x234] sm:$0xf0] }
  0x9a   :  { %1174 = vmatpush.bf16.msrb.mxu3 %v2403_v6  ;;  %1164 = vmatpush.bf16.msrb.mxu2 %v2315_v21  ;;  %v2544_v6 = vld [vmem:[#allocation5 + $0x2d8] sm:$0xf0] }
  0x9b   :  { %v2547_v7 = vor.u32 %v2911_v5, %v2544_v6  ;;  %v2456_v5 = vld [vmem:[#allocation5 + $0x230] sm:$0xf0] }
  0x9e   :  { %1175 = vmatpush.bf16.msrb.mxu3 %v2395_v16  ;;  %v2527_v16 = vor.u32 %v2909_v14, %v2526_v13  ;;  %v2888_v13 = vld [vmem:[#allocation5 + $0x20c] sm:$0xf0] }
  0xa2   :  { %1176 = vmatpush.bf16.msrb.mxu3 %v2387_v22 }
  0xa6   :  { %1177 = vmatpush.bf16.msrb.mxu3 %v2379_v25  ;;  %v2902_v25 = vld [vmem:[#allocation5 + $0x284] sm:$0xf] }
  0xb3   :  { %v651_v49 = vpop.f32.mrf.mxu0 }
  0xb4   :  { %v652_v38 = vadd.f32 %v651_v49, %v314_v31  ;;  %v664_v53 = vpop.f32.mrf.mxu1  ;;  %v317_v31 = vperm.slane %v3280_v19, 3 }
  0xb6   :  { %v665_v42 = vadd.f32 %v664_v53, %v652_v38 }
  0xb8   :  { %v746_v47 = vmax.f32 %v665_v42, 0.0 }
  0xba   :  { %v750_v52 = vpack.c.bf16 %v746_v47, %v746_v47 }
  0xbb   :  { %v677_v54 = vpop.f32.mrf.mxu2  ;;  %v653_v58 = vpop.f32.mrf.mxu0 }
  0xbc   :  { %v678_v56 = vadd.f32 %v677_v54, %v315_v44  ;;  %v690_v57 = vpop.f32.mrf.mxu3  ;;  %1087 = vmatmul.bf16.vlgmr.msra.gmra.mxu0 %v750_v52  ;;  %v666_v61 = vpop.f32.mrf.mxu1  ;;  %v2550_v44 = vld [vmem:[#allocation5 + $0x2e0] sm:$0xf]  ;;  %v2555_v54 = vor.u32 %v2914_v46, %v2552_v48  ;;  %v2899_v46 = vld [vmem:[#allocation5 + $0x26c] sm:$0xf] }
  0xbd   :  { %v2551_v47 = vor.u32 %v2916_v45, %v2550_v44  ;;  %v2912_v61 = vld [vmem:[#allocation5 + $0x2cc] sm:$0xf0] }
  0xbe   :  { %v691_v63 = vadd.f32 %v690_v57, %v678_v56  ;;  %v2915_v56 = vld [vmem:[#allocation5 + $0x2ec] sm:$0xf]  ;;  %v2560_v57 = vld [vmem:[#allocation5 + $0x2f8] sm:$0xf0] }
  0xbf   :  { %1358 = vmatpush.bf16.msra.mxu0 %v2551_v47  ;;  %v2563_v59 = vor.u32 %v2915_v56, %v2560_v57  ;;  %v2496_v47 = vld [vmem:[#allocation5 + $0x278] sm:$0xf0]  ;;  %v2478_v56 = vld [vmem:[#allocation5 + $0x248] sm:$0xf]  ;;  %v2897_v57 = vld [vmem:[#allocation5 + $0x254] sm:$0xf0] }
  0xc0   :  { %v747_v3 = vmax.f32 %v691_v63, 0.0  ;;  %v2535_v63 = vor.u32 %v2912_v61, %v2534_v60  ;;  %v2499_v48 = vor.u32 %v2899_v46, %v2496_v47  ;;  %v2814_v46 = vld [vmem:[#allocation7 + $0x3e8] sm:$0xf]  ;;  %v3045_v47 = vld [vmem:[#allocation7 + $0x3f4] sm:$0xf0] }
  0xc2   :  { %v751_v10 = vpack.c.bf16 %v747_v3, %v747_v3  ;;  %v2539_v3 = vor.u32 %v2910_v62, %v2536_v0  ;;  %v2479_v62 = vor.u32 %v2897_v57, %v2478_v56  ;;  %v2480_v0 = vld [vmem:[#allocation5 + $0x258] sm:$0xf0]  ;;  %v3009_v56 = vld [vmem:[#allocation7 + $0x1b4] sm:$0xf0]  ;;  %v2742_v57 = vld [vmem:[#allocation7 + $0x2c8] sm:$0xf] }
  0xc3   :  { %v679_v15 = vpop.f32.mrf.mxu2  ;;  %1359 = vmatpush.bf16.msra.mxu0 %v2535_v63  ;;  %v2895_v63 = vld [vmem:[#allocation5 + $0x24c] sm:$0xf] }
  0xc4   :  { %1100 = vmatmul.bf16.vlgmr.msra.gmra.mxu1 %v751_v10  ;;  %v692_v17 = vpop.f32.mrf.mxu3  ;;  %v2483_v2 = vor.u32 %v2895_v63, %v2480_v0  ;;  %v3043_v63 = vld [vmem:[#allocation7 + $0x3d4] sm:$0xf0] }
  0xc5   :  { %1371 = vmatpush.bf16.msra.mxu1 %v2555_v54  ;;  %v2907_v17 = vld [vmem:[#allocation5 + $0x2ac] sm:$0xf]  ;;  %v2471_v54 = vor.u32 %v2896_v51, %v2470_v50  ;;  %v2815_v51 = vor.u32 %v3045_v47, %v2814_v46  ;;  %v3019_v46 = vld [vmem:[#allocation7 + $0x254] sm:$0xf0]  ;;  %v2774_v47 = vld [vmem:[#allocation7 + $0x348] sm:$0xf] }
  0xc6   :  { %v2531_v21 = vor.u32 %v2907_v17, %v2528_v18  ;;  %v2440_v17 = vld [vmem:[#allocation5 + $0x210] sm:$0xf0]  ;;  %v2446_v18 = vld [vmem:[#allocation5 + $0x208] sm:$0xf] }
  0xc7   :  { %1360 = vmatpush.bf16.msra.mxu0 %v2519_v11  ;;  %v2464_v11 = vld [vmem:[#allocation5 + $0x238] sm:$0xf0] }
  0xc9   :  { %1372 = vmatpush.bf16.msra.mxu1 %v2539_v3  ;;  %v2892_v3 = vld [vmem:[#allocation5 + $0x22c] sm:$0xf0] }
  0xca   :  { %v2455_v6 = vor.u32 %v2892_v3, %v2454_v1  ;;  %v2991_v3 = vld [vmem:[#allocation7 + $0x94] sm:$0xf0] }
  0xcc   :  { %1139 = vmatmul.bf16.vlgmr.msrb.gmra.mxu0 %v750_v52 }
  0xd3   :  { %v703_v27 = vpop.f32.mrf.mxu0 }
  0xd4   :  { %v704_v28 = vadd.f32 %v703_v27, %v316_v26  ;;  %v716_v29 = vpop.f32.mrf.mxu1  ;;  %1152 = vmatmul.bf16.vlgmr.msrb.gmra.mxu1 %v751_v10  ;;  %v2906_v10 = vld [vmem:[#allocation5 + $0x2a4] sm:$0xf]  ;;  %v2503_v26 = vor.u32 %v2904_v24, %v2502_v23  ;;  %v2504_v27 = vld [vmem:[#allocation5 + $0x290] sm:$0xf0]  ;;  %v2887_v23 = vld [vmem:[#allocation5 + $0x20c] sm:$0xf] }
  0xd5   :  { %v2523_v15 = vor.u32 %v2906_v10, %v2520_v12  ;;  %v2891_v10 = vld [vmem:[#allocation5 + $0x22c] sm:$0xf]  ;;  %v2438_v12 = vld [vmem:[#allocation5 + $0x200] sm:$0xf]  ;;  %v2448_v24 = vld [vmem:[#allocation5 + $0x218] sm:$0xf0] }
  0xd6   :  { %v717_v30 = vadd.f32 %v716_v29, %v704_v28  ;;  %v2510_v28 = vld [vmem:[#allocation5 + $0x288] sm:$0xf]  ;;  %v2905_v29 = vld [vmem:[#allocation5 + $0x294] sm:$0xf0]  ;;  %1361 = vmatpush.bf16.msra.mxu0 %v2503_v26 }
  0xd7   :  { %1373 = vmatpush.bf16.msra.mxu1 %v2523_v15  ;;  %v2467_v15 = vor.u32 %v2891_v10, %v2464_v11  ;;  %v3007_v10 = vld [vmem:[#allocation7 + $0x194] sm:$0xf0] }
  0xd8   :  { %v748_v32 = vmax.f32 %v717_v30, 0.0  ;;  %v2507_v30 = vor.u32 %v2902_v25, %v2504_v27 }
  0xda   :  { %v752_v33 = vpack.c.bf16 %v748_v32, %v748_v32  ;;  %v2903_v32 = vld [vmem:[#allocation5 + $0x28c] sm:$0xf] }
  0xdb   :  { %v729_v34 = vpop.f32.mrf.mxu2  ;;  %v705_v36 = vpop.f32.mrf.mxu0  ;;  %1374 = vmatpush.bf16.msra.mxu1 %v2507_v30 }
  0xdc   :  { %v730_v35 = vadd.f32 %v729_v34, %v317_v31  ;;  %v742_v49 = vpop.f32.mrf.mxu3  ;;  %v718_v37 = vpop.f32.mrf.mxu1  ;;  %1113 = vmatmul.bf16.vlgmr.msra.gmra.mxu2 %v752_v33  ;;  %v2511_v31 = vor.u32 %v2905_v29, %v2510_v28  ;;  %v3294_v34 = vld [vmem:[#allocation8 + $0x4] sm:$0x3]  ;;  %v2900_v36 = vld [vmem:[#allocation5 + $0x26c] sm:$0xf0]  ;;  %v2451_v29 = vor.u32 %v2887_v23, %v2448_v24  ;;  %v2590_v23 = vld [vmem:[#allocation7 + $0x68] sm:$0xf] }
  0xdd   :  { %1384 = vmatpush.bf16.msra.mxu2 %v2559_v55  ;;  %v2898_v37 = vld [vmem:[#allocation5 + $0x264] sm:$0xf]  ;;  %v2472_v55 = vld [vmem:[#allocation5 + $0x250] sm:$0xf0]  ;;  %v2989_v24 = vld [vmem:[#allocation7 + $0x74] sm:$0xf0] }
  0xde   :  { %v743_v38 = vadd.f32 %v742_v49, %v730_v35  ;;  %v2486_v49 = vld [vmem:[#allocation5 + $0x260] sm:$0xf] }
  0xe0   :  { %v749_v53 = vmax.f32 %v743_v38, 0.0  ;;  %v2487_v38 = vor.u32 %v2900_v36, %v2486_v49  ;;  %v3013_v36 = vld [vmem:[#allocation7 + $0x1f4] sm:$0xf0] }
  0xe1   :  { %1385 = vmatpush.bf16.msra.mxu2 %v2543_v4  ;;  %v2890_v4 = vld [vmem:[#allocation5 + $0x224] sm:$0xf] }
  0xe2   :  { %v753_v39 = vpack.c.bf16 %v749_v53, %v749_v53  ;;  %v2488_v53 = vld [vmem:[#allocation5 + $0x270] sm:$0xf0]  ;;  %1362 = vmatpush.bf16.msra.mxu0 %v2487_v38  ;;  %v2995_v38 = vld [vmem:[#allocation7 + $0xd4] sm:$0xf0] }
  0xe3   :  { %v731_v40 = vpop.f32.mrf.mxu2  ;;  %v2491_v44 = vor.u32 %v2898_v37, %v2488_v53  ;;  %v2614_v37 = vld [vmem:[#allocation7 + $0xc8] sm:$0xf] }
  0xe4   :  { %v744_v41 = vpop.f32.mrf.mxu3  ;;  %1126 = vmatmul.bf16.vlgmr.msra.gmra.mxu3 %v753_v39  ;;  %v2901_v40 = vld [vmem:[#allocation5 + $0x274] sm:$0xf0] }
  0xe5   :  { %1397 = vmatpush.bf16.msra.mxu3 %v2563_v59  ;;  %1386 = vmatpush.bf16.msra.mxu2 %v2527_v16  ;;  %v755_v41 = vperm.slane %v3294_v34, 0  ;;  %v2886_v16 = vld [vmem:[#allocation5 + $0x204] sm:$0xf] }
  0xe6   :  { %1375 = vmatpush.bf16.msra.mxu1 %v2491_v44  ;;  %1363 = vmatpush.bf16.msra.mxu0 %v2471_v54  ;;  %v2443_v26 = vor.u32 %v2886_v16, %v2440_v17  ;;  %v2615_v44 = vor.u32 %v2995_v38, %v2614_v37  ;;  %v2993_v54 = vld [vmem:[#allocation7 + $0xb4] sm:$0xf0]  ;;  %v2790_v17 = vld [vmem:[#allocation7 + $0x388] sm:$0xf] }
  0xe7   :  { %v3023_v16 = vld [vmem:[#allocation7 + $0x294] sm:$0xf0]  ;;  %v2582_v37 = vld [vmem:[#allocation7 + $0x48] sm:$0xf] }
  0xe8   :  { %v2987_v38 = vld [vmem:[#allocation7 + $0x54] sm:$0xf0] }
  0xe9   :  { %1398 = vmatpush.bf16.msra.mxu3 %v2547_v7  ;;  %1387 = vmatpush.bf16.msra.mxu2 %v2511_v31  ;;  %v2459_v7 = vor.u32 %v2890_v4, %v2456_v5  ;;  %v756_v31 = vperm.slane %v3294_v34, 1 }
  0xea   :  { %1364 = vmatpush.bf16.msra.mxu0 %v2455_v6  ;;  %v2734_v6 = vld [vmem:[#allocation7 + $0x2a8] sm:$0xf] }
  0xec   :  { %1165 = vmatmul.bf16.vlgmr.msrb.gmra.mxu2 %v752_v33  ;;  %v2512_v33 = vld [vmem:[#allocation5 + $0x298] sm:$0xf0] }
  0xed   :  { %1399 = vmatpush.bf16.msra.mxu3 %v2531_v21  ;;  %v2515_v35 = vor.u32 %v2903_v32, %v2512_v33  ;;  %v2439_v21 = vor.u32 %v2888_v13, %v2438_v12  ;;  %v2622_v32 = vld [vmem:[#allocation7 + $0xe8] sm:$0xf]  ;;  %v2997_v33 = vld [vmem:[#allocation7 + $0xf4] sm:$0xf0] }
  0xee   :  { %v2623_v49 = vor.u32 %v2997_v33, %v2622_v32  ;;  %v2726_v13 = vld [vmem:[#allocation7 + $0x288] sm:$0xf]  ;;  %v3021_v32 = vld [vmem:[#allocation7 + $0x274] sm:$0xf0] }
  0xef   :  { %1365 = vmatpush.bf16.msra.mxu0 %v2439_v21  ;;  %v2782_v33 = vld [vmem:[#allocation7 + $0x368] sm:$0xf] }
  0xf1   :  { %1400 = vmatpush.bf16.msra.mxu3 %v2515_v35  ;;  %v2686_v35 = vld [vmem:[#allocation7 + $0x1e8] sm:$0xf] }
  0xf2   :  { %v2687_v53 = vor.u32 %v3013_v36, %v2686_v35  ;;  %v3037_v35 = vld [vmem:[#allocation7 + $0x374] sm:$0xf0] }
  0xf3   :  { %1743 = vmatpush.bf16.msrb.mxu0 %v2623_v49 }
  0xf4   :  { %1178 = vmatmul.bf16.vlgmr.msrb.gmra.mxu3 %v753_v39  ;;  %v2494_v39 = vld [vmem:[#allocation5 + $0x268] sm:$0xf] }
  0xf5   :  { %v2495_v45 = vor.u32 %v2901_v40, %v2494_v39  ;;  %1401 = vmatpush.bf16.msra.mxu3 %v2499_v48  ;;  %v2678_v39 = vld [vmem:[#allocation7 + $0x1c8] sm:$0xf]  ;;  %v3011_v40 = vld [vmem:[#allocation7 + $0x1d4] sm:$0xf0] }
  0xf6   :  { %v2679_v34 = vor.u32 %v3011_v40, %v2678_v39  ;;  %v3003_v39 = vld [vmem:[#allocation7 + $0x154] sm:$0xf0] }
  0xf7   :  { %1388 = vmatpush.bf16.msra.mxu2 %v2495_v45  ;;  %v3029_v45 = vld [vmem:[#allocation7 + $0x2f4] sm:$0xf0]  ;;  %1744 = vmatpush.bf16.msrb.mxu0 %v2615_v44 }
  0xf9   :  { %1402 = vmatpush.bf16.msra.mxu3 %v2483_v2  ;;  %v2598_v2 = vld [vmem:[#allocation7 + $0x88] sm:$0xf] }
  0xfb   :  { %1389 = vmatpush.bf16.msra.mxu2 %v2479_v62  ;;  %v2806_v62 = vld [vmem:[#allocation7 + $0x3c8] sm:$0xf] }
  0xfc   :  { %v2807_v1 = vor.u32 %v3043_v63, %v2806_v62  ;;  %v2766_v62 = vld [vmem:[#allocation7 + $0x328] sm:$0xf]  ;;  %v3033_v63 = vld [vmem:[#allocation7 + $0x334] sm:$0xf0] }
  0xfd   :  { %1403 = vmatpush.bf16.msra.mxu3 %v2467_v15  ;;  %v2599_v15 = vor.u32 %v2991_v3, %v2598_v2  ;;  %v2566_v2 = vld [vmem:[#allocation7 + $0x8] sm:$0xf] }
 0x101   :  { %1404 = vmatpush.bf16.msra.mxu3 %v2451_v29 }
 0x105   :  { %1782 = vmatpush.bf16.msrb.mxu3 %v2815_v51  ;;  %v2985_v51 = vld [vmem:[#allocation7 + $0x34] sm:$0xf0] }
 0x109   :  { %1783 = vmatpush.bf16.msrb.mxu3 %v2807_v1 }
 0x139   :  { %v3286_v42 = vpop.f32.mrf.mxu0 }
 0x13a   :  { %v1089_v59 = vadd.f32 %v3286_v42, %v755_v41  ;;  %v2463_v42 = vor.u32 %v2893_v9, %v2462_v8  ;;  %v2750_v41 = vld [vmem:[#allocation7 + $0x2e8] sm:$0xf] }
 0x13b   :  { %v2751_v50 = vor.u32 %v3029_v45, %v2750_v41  ;;  %v2798_v8 = vld [vmem:[#allocation7 + $0x3a8] sm:$0xf]  ;;  %v2783_v41 = vor.u32 %v3037_v35, %v2782_v33  ;;  %v2583_v45 = vor.u32 %v2987_v38, %v2582_v37  ;;  %v3008_v37 = vld [vmem:[#allocation7 + $0x1ac] sm:$0xf] }
 0x13c   :  { %1390 = vmatpush.bf16.msra.mxu2 %v2463_v42  ;;  %v2662_v9 = vld [vmem:[#allocation7 + $0x188] sm:$0xf] }
 0x141   :  { %v3288_v43 = vpop.f32.mrf.mxu1  ;;  %v1090_v19 = vpop.f32.mrf.mxu0 }
 0x142   :  { %v1102_v14 = vadd.f32 %v3288_v43, %v1089_v59  ;;  %v3027_v59 = vld [vmem:[#allocation7 + $0x2d4] sm:$0xf0] }
 0x149   :  { %v1103_v52 = vpop.f32.mrf.mxu1  ;;  %v3290_v58 = vpop.f32.mrf.mxu0 }
 0x14a   :  { %v2894_v52 = vld [vmem:[#allocation5 + $0x244] sm:$0xf] }
 0x14b   :  { %v2475_v61 = vor.u32 %v2894_v52, %v2472_v55  ;;  %v2606_v52 = vld [vmem:[#allocation7 + $0xa8] sm:$0xf] }
 0x14c   :  { %v2670_v55 = vld [vmem:[#allocation7 + $0x1a8] sm:$0xf]  ;;  %v2607_v0 = vor.u32 %v2993_v54, %v2606_v52  ;;  %v3001_v54 = vld [vmem:[#allocation7 + $0x134] sm:$0xf0] }
 0x14d   :  { %1376 = vmatpush.bf16.msra.mxu1 %v2475_v61  ;;  %v2743_v61 = vor.u32 %v3027_v59, %v2742_v57  ;;  %v2671_v5 = vor.u32 %v3009_v56, %v2670_v55  ;;  %v2638_v52 = vld [vmem:[#allocation7 + $0x128] sm:$0xf]  ;;  %v82_v55 = vld [vmem:[#allocation2 + $0x10] sm:$0xff] }
 0x14e   :  { %1745 = vmatpush.bf16.msrb.mxu0 %v2607_v0  ;;  %v2702_v59 = vld [vmem:[#allocation7 + $0x228] sm:$0xf]  ;;  %v2639_v1 = vor.u32 %v3001_v54, %v2638_v52  ;;  %v3024_v54 = vld [vmem:[#allocation7 + $0x2ac] sm:$0xf] }
 0x151   :  { %v3292_v20 = vpop.f32.mrf.mxu1  ;;  %v1142_v22 = vpop.f32.mrf.mxu0  ;;  %1377 = vmatpush.bf16.msra.mxu1 %v2459_v7  ;;  %v3025_v7 = vld [vmem:[#allocation7 + $0x2b4] sm:$0xf0] }
 0x152   :  { %v2889_v22 = vld [vmem:[#allocation5 + $0x214] sm:$0xf0]  ;;  %v2735_v11 = vor.u32 %v3025_v7, %v2734_v6  ;;  %1746 = vmatpush.bf16.msrb.mxu0 %v2599_v15  ;;  %v2996_v7 = vld [vmem:[#allocation7 + $0xec] sm:$0xf] }
 0x153   :  { %v2447_v27 = vor.u32 %v2889_v22, %v2446_v18  ;;  %v2663_v22 = vor.u32 %v3007_v10, %v2662_v9  ;;  %v2999_v6 = vld [vmem:[#allocation7 + $0x114] sm:$0xf0]  ;;  %v3012_v9 = vld [vmem:[#allocation7 + $0x1ec] sm:$0xf] }
 0x154   :  { %v3031_v15 = vld [vmem:[#allocation7 + $0x314] sm:$0xf0] }
 0x155   :  { %1378 = vmatpush.bf16.msra.mxu1 %v2443_v26  ;;  %1391 = vmatpush.bf16.msra.mxu2 %v2447_v27  ;;  %v3005_v26 = vld [vmem:[#allocation7 + $0x174] sm:$0xf0] }
 0x159   :  { %v1155_v19 = vpop.f32.mrf.mxu1  ;;  %1756 = vmatpush.bf16.msrb.mxu1 %v2687_v53  ;;  %1769 = vmatpush.bf16.msrb.mxu2 %v2751_v50  ;;  %v2646_v53 = vld [vmem:[#allocation7 + $0x148] sm:$0xf] }
 0x15a   :  { %v2574_v50 = vld [vmem:[#allocation7 + $0x28] sm:$0xf] }
 0x15d   :  { %1757 = vmatpush.bf16.msrb.mxu1 %v2679_v34  ;;  %1770 = vmatpush.bf16.msrb.mxu2 %v2743_v61  ;;  %v2647_v34 = vor.u32 %v3003_v39, %v2646_v53  ;;  %v3017_v61 = vld [vmem:[#allocation7 + $0x234] sm:$0xf0]  ;;  %v2672_v53 = vld [vmem:[#allocation7 + $0x1b8] sm:$0xf0] }
 0x15e   :  { %v2703_v10 = vor.u32 %v3017_v61, %v2702_v59  ;;  %v2675_v39 = vor.u32 %v3008_v37, %v2672_v53  ;;  %v2800_v59 = vld [vmem:[#allocation7 + $0x3b8] sm:$0xf0]  ;;  %v2988_v61 = vld [vmem:[#allocation7 + $0x6c] sm:$0xf] }
 0x15f   :  { %v1114_v60 = vpop.f32.mrf.mxu2  ;;  %v3016_v37 = vld [vmem:[#allocation7 + $0x22c] sm:$0xf] }
 0x160   :  { %v1115_v25 = vadd.f32 %v1114_v60, %v1102_v14  ;;  %v1141_v60 = vadd.f32 %v3290_v58, %v756_v31  ;;  %v3041_v58 = vld [vmem:[#allocation7 + $0x3b4] sm:$0xf0]  ;;  %v2591_v31 = vor.u32 %v2989_v24, %v2590_v23  ;;  %v2816_v23 = vld [vmem:[#allocation7 + $0x3f8] sm:$0xf0]  ;;  %v3032_v53 = vld [vmem:[#allocation7 + $0x32c] sm:$0xf] }
 0x161   :  { %v2799_v12 = vor.u32 %v3041_v58, %v2798_v8  ;;  %1758 = vmatpush.bf16.msrb.mxu1 %v2671_v5  ;;  %1771 = vmatpush.bf16.msrb.mxu2 %v2735_v11  ;;  %v2630_v5 = vld [vmem:[#allocation7 + $0x108] sm:$0xf]  ;;  %v2624_v8 = vld [vmem:[#allocation7 + $0xf8] sm:$0xf0]  ;;  %v2767_v58 = vor.u32 %v3033_v63, %v2766_v62 }
 0x162   :  { %v1154_v4 = vadd.f32 %v3292_v20, %v1141_v60  ;;  %v3039_v20 = vld [vmem:[#allocation7 + $0x394] sm:$0xf0]  ;;  %1747 = vmatpush.bf16.msrb.mxu0 %v2591_v31  ;;  %v2575_v60 = vor.u32 %v2985_v51, %v2574_v50  ;;  %v2688_v11 = vld [vmem:[#allocation7 + $0x1f8] sm:$0xf0]  ;;  %v2627_v24 = vor.u32 %v2996_v7, %v2624_v8 }
 0x163   :  { %1784 = vmatpush.bf16.msrb.mxu3 %v2799_v12  ;;  %v2791_v29 = vor.u32 %v3039_v20, %v2790_v17  ;;  %v2694_v12 = vld [vmem:[#allocation7 + $0x208] sm:$0xf]  ;;  %v2664_v51 = vld [vmem:[#allocation7 + $0x198] sm:$0xf0] }
 0x164   :  { %v2592_v62 = vld [vmem:[#allocation7 + $0x78] sm:$0xf0] }
 0x165   :  { %1759 = vmatpush.bf16.msrb.mxu1 %v2663_v22  ;;  %v3044_v22 = vld [vmem:[#allocation7 + $0x3ec] sm:$0xf]  ;;  %v2595_v63 = vor.u32 %v2988_v61, %v2592_v62  ;;  %v2792_v7 = vld [vmem:[#allocation7 + $0x398] sm:$0xf0] }
 0x166   :  { %1748 = vmatpush.bf16.msrb.mxu0 %v2583_v45  ;;  %v2808_v45 = vld [vmem:[#allocation7 + $0x3d8] sm:$0xf0] }
 0x167   :  { %v1127_v28 = vpop.f32.mrf.mxu3  ;;  %v1116_v43 = vpop.f32.mrf.mxu2  ;;  %1785 = vmatpush.bf16.msrb.mxu3 %v2791_v29 }
 0x168   :  { %v3299_v30 = vadd.f32 %v1127_v28, %v1115_v25  ;;  %v2654_v25 = vld [vmem:[#allocation7 + $0x168] sm:$0xf]  ;;  %v2727_v28 = vor.u32 %v3023_v16, %v2726_v13  ;;  %v3015_v13 = vld [vmem:[#allocation7 + $0x214] sm:$0xf0]  ;;  %v3028_v16 = vld [vmem:[#allocation7 + $0x2ec] sm:$0xf] }
 0x169   :  { %v2718_v43 = vld [vmem:[#allocation7 + $0x268] sm:$0xf]  ;;  %v2655_v36 = vor.u32 %v3005_v26, %v2654_v25  ;;  %v2691_v25 = vor.u32 %v3012_v9, %v2688_v11  ;;  %v2994_v26 = vld [vmem:[#allocation7 + $0xcc] sm:$0xf]  ;;  %v2695_v29 = vor.u32 %v3015_v13, %v2694_v12  ;;  %v2648_v11 = vld [vmem:[#allocation7 + $0x158] sm:$0xf0] }
 0x16a   :  { %1887 = vst [vmem:[#allocation11] sm:$0xff] %v3299_v30  ;;  %1772 = vmatpush.bf16.msrb.mxu2 %v2727_v28  ;;  %v2719_v40 = vor.u32 %v3021_v32, %v2718_v43  ;;  %1749 = vmatpush.bf16.msrb.mxu0 %v2575_v60  ;;  %v2680_v28 = vld [vmem:[#allocation7 + $0x1d8] sm:$0xf0]  ;;  %v2819_v32 = vor.u32 %v3044_v22, %v2816_v23  ;;  %v2986_v9 = vld [vmem:[#allocation7 + $0x4c] sm:$0xf] }
 0x16b   :  { %1760 = vmatpush.bf16.msrb.mxu1 %v2655_v36  ;;  %1786 = vmatpush.bf16.msrb.mxu3 %v2783_v41  ;;  %v2608_v36 = vld [vmem:[#allocation7 + $0xb8] sm:$0xf0]  ;;  %v3020_v13 = vld [vmem:[#allocation7 + $0x26c] sm:$0xf] }
 0x16c   :  { %v2744_v41 = vld [vmem:[#allocation7 + $0x2d8] sm:$0xf0]  ;;  %v3000_v22 = vld [vmem:[#allocation7 + $0x12c] sm:$0xf] }
 0x16e   :  { %1773 = vmatpush.bf16.msrb.mxu2 %v2719_v40  ;;  %v3026_v40 = vld [vmem:[#allocation7 + $0x2cc] sm:$0xf] }
 0x16f   :  { %v1129_v19 = vpop.f32.mrf.mxu3  ;;  %v1166_v48 = vpop.f32.mrf.mxu2  ;;  %1761 = vmatpush.bf16.msrb.mxu1 %v2647_v34  ;;  %v3006_v34 = vld [vmem:[#allocation7 + $0x18c] sm:$0xf] }
 0x170   :  { %v1167_v42 = vadd.f32 %v1166_v48, %v1154_v4  ;;  %v2710_v19 = vld [vmem:[#allocation7 + $0x248] sm:$0xf]  ;;  %v3035_v48 = vld [vmem:[#allocation7 + $0x354] sm:$0xf0]  ;;  %v2667_v52 = vor.u32 %v3006_v34, %v2664_v51 }
 0x171   :  { %v2711_v56 = vor.u32 %v3019_v46, %v2710_v19  ;;  %v2775_v57 = vor.u32 %v3035_v48, %v2774_v47  ;;  %v2983_v4 = vld [vmem:[#allocation7 + $0x14] sm:$0xf0]  ;;  %v2747_v19 = vor.u32 %v3026_v40, %v2744_v41  ;;  %v2990_v47 = vld [vmem:[#allocation7 + $0x8c] sm:$0xf]  ;;  %v2600_v48 = vld [vmem:[#allocation7 + $0x98] sm:$0xf0] }
 0x172   :  { %v2567_v20 = vor.u32 %v2983_v4, %v2566_v2  ;;  %v2603_v50 = vor.u32 %v2990_v47, %v2600_v48  ;;  %v2728_v4 = vld [vmem:[#allocation7 + $0x298] sm:$0xf0]  ;;  %v309_v34 = vld [vmem:[#allocation8 + $0x6] sm:$0xf] }
 0x173   :  { %1774 = vmatpush.bf16.msrb.mxu2 %v2711_v56  ;;  %1787 = vmatpush.bf16.msrb.mxu3 %v2775_v57  ;;  %v3040_v56 = vld [vmem:[#allocation7 + $0x3ac] sm:$0xf]  ;;  %v2768_v40 = vld [vmem:[#allocation7 + $0x338] sm:$0xf0]  ;;  %v1191_v51 = vperm.slane %v309_v34, 1  ;;  %v1193_v61 = vperm.slane %v309_v34, 3 }
 0x174   :  { %1762 = vmatpush.bf16.msrb.mxu1 %v2639_v1  ;;  %1750 = vmatpush.bf16.msrb.mxu0 %v2567_v20  ;;  %v2803_v60 = vor.u32 %v3040_v56, %v2800_v59  ;;  %v2656_v1 = vld [vmem:[#allocation7 + $0x178] sm:$0xf0]  ;;  %v2771_v41 = vor.u32 %v3032_v53, %v2768_v40 }
 0x175   :  { %v2760_v47 = vld [vmem:[#allocation7 + $0x318] sm:$0xf0] }
 0x177   :  { %v1179_v14 = vpop.f32.mrf.mxu3  ;;  %v1168_v21 = vpop.f32.mrf.mxu2  ;;  %1775 = vmatpush.bf16.msrb.mxu2 %v2703_v10  ;;  %1788 = vmatpush.bf16.msrb.mxu3 %v2767_v58  ;;  %v2584_v10 = vld [vmem:[#allocation7 + $0x58] sm:$0xf0]  ;;  %v3002_v58 = vld [vmem:[#allocation7 + $0x14c] sm:$0xf] }
 0x178   :  { %v1180_v18 = vadd.f32 %v1179_v14, %v1167_v42  ;;  %v2758_v14 = vld [vmem:[#allocation7 + $0x308] sm:$0xf]  ;;  %v2752_v21 = vld [vmem:[#allocation7 + $0x2f8] sm:$0xf0]  ;;  %v2651_v12 = vor.u32 %v3002_v58, %v2648_v11 }
 0x179   :  { %v2759_v43 = vor.u32 %v3031_v15, %v2758_v14  ;;  %v2755_v31 = vor.u32 %v3028_v16, %v2752_v21  ;;  %v2720_v14 = vld [vmem:[#allocation7 + $0x278] sm:$0xf0]  ;;  %v3036_v15 = vld [vmem:[#allocation7 + $0x36c] sm:$0xf] }
 0x17a   :  { %v1183_v27 = vmul.f32 0.5, %v1180_v18  ;;  %1888 = vst [vmem:[#allocation11 + $0x8] sm:$0xff] %v1180_v18  ;;  %v2631_v18 = vor.u32 %v2999_v6, %v2630_v5  ;;  %v3038_v5 = vld [vmem:[#allocation7 + $0x38c] sm:$0xf]  ;;  %v2723_v16 = vor.u32 %v3020_v13, %v2720_v14  ;;  %v2576_v21 = vld [vmem:[#allocation7 + $0x38] sm:$0xf0] }
 0x17b   :  { %1776 = vmatpush.bf16.msrb.mxu2 %v2695_v29  ;;  %1789 = vmatpush.bf16.msrb.mxu3 %v2759_v43  ;;  %v2795_v8 = vor.u32 %v3038_v5, %v2792_v7  ;;  %v2776_v29 = vld [vmem:[#allocation7 + $0x358] sm:$0xf0]  ;;  %v2982_v43 = vld [vmem:[#allocation7 + $0xc] sm:$0xf]  ;;  %1910 = dma.vmem_to_hbm [thread:$0]  %s1906_s3, 256, %s1908_s15, [#allocation12]  }
 0x17c   :  { %v1184_v49 = vmul.f32 1.442695, %v1183_v27  ;;  %v3010_v27 = vld [vmem:[#allocation7 + $0x1cc] sm:$0xf]  ;;  %1763 = vmatpush.bf16.msrb.mxu1 %v2631_v18 }
 0x17d   :  { %v2683_v35 = vor.u32 %v3010_v27, %v2680_v28  ;;  %v2984_v18 = vld [vmem:[#allocation7 + $0x2c] sm:$0xf] }
 0x17e   :  { %3054 = vpow2.f32 %v1184_v49  ;;  %v2992_v49 = vld [vmem:[#allocation7 + $0xac] sm:$0xf]  ;;  %v2579_v23 = vor.u32 %v2984_v18, %v2576_v21 }
 0x17f   :  { %v1181_v44 = vpop.f32.mrf.mxu3  ;;  %v2611_v38 = vor.u32 %v2992_v49, %v2608_v36  ;;  %v3034_v28 = vld [vmem:[#allocation7 + $0x34c] sm:$0xf] }
 0x180   :  { %v3042_v44 = vld [vmem:[#allocation7 + $0x3cc] sm:$0xf] }
 0x181   :  { %v2811_v46 = vor.u32 %v3042_v44, %v2808_v45  ;;  %v2696_v44 = vld [vmem:[#allocation7 + $0x218] sm:$0xf0]  ;;  %v3030_v45 = vld [vmem:[#allocation7 + $0x30c] sm:$0xf] }
 0x182   :  { %v2763_v48 = vor.u32 %v3030_v45, %v2760_v47 }
 0x184   :  { %v3055_v0 = vpop.eup %3054 }
 0x185   :  { %v1186_v3 = vmul.f32 %v3055_v0, %v82_v55  ;;  %v2736_v55 = vld [vmem:[#allocation7 + $0x2b8] sm:$0xf0]  ;;  %v3004_v0 = vld [vmem:[#allocation7 + $0x16c] sm:$0xf] }
 0x186   :  { %v2739_v57 = vor.u32 %v3024_v54, %v2736_v55  ;;  %v2659_v2 = vor.u32 %v3004_v0, %v2656_v1 }
 0x187   :  { %v1187_v42 = vadd.f32 %v1186_v3, %v3299_v30  ;;  %v2616_v30 = vld [vmem:[#allocation7 + $0xd8] sm:$0xf0]  ;;  %v3022_v3 = vld [vmem:[#allocation7 + $0x28c] sm:$0xf] }
 0x188   :  { %v2619_v33 = vor.u32 %v2994_v26, %v2616_v30  ;;  %v2731_v6 = vor.u32 %v3022_v3, %v2728_v4  ;;  %v2712_v26 = vld [vmem:[#allocation7 + $0x258] sm:$0xf0] }
 0x189   :  { %v1188_v17 = vpack.c.bf16 %v1187_v42, %v1187_v42  ;;  %v2587_v42 = vor.u32 %v2986_v9, %v2584_v10 }
 0x18b   :  { %1366 = vmatmul.bf16.vlgmr.msra.gmra.mxu0 %v1188_v17  ;;  %1379 = vmatmul.bf16.vlgmr.msra.gmra.mxu1 %v1188_v17 }
 0x18c   :  { %1392 = vmatmul.bf16.vlgmr.msra.gmra.mxu2 %v1188_v17  ;;  %1405 = vmatmul.bf16.vlgmr.msra.gmra.mxu3 %v1188_v17  ;;  %v2784_v17 = vld [vmem:[#allocation7 + $0x378] sm:$0xf0] }
 0x18d   :  { %1795 = vmatpush.bf16.msra.mxu0 %v2627_v24  ;;  %1808 = vmatpush.bf16.msra.mxu1 %v2691_v25  ;;  %v2787_v20 = vor.u32 %v3036_v15, %v2784_v17  ;;  %v2640_v24 = vld [vmem:[#allocation7 + $0x138] sm:$0xf0]  ;;  %v3018_v25 = vld [vmem:[#allocation7 + $0x24c] sm:$0xf] }
 0x18e   :  { %1821 = vmatpush.bf16.msra.mxu2 %v2755_v31  ;;  %1834 = vmatpush.bf16.msra.mxu3 %v2819_v32  ;;  %v2643_v30 = vor.u32 %v3000_v22, %v2640_v24  ;;  %v2715_v27 = vor.u32 %v3018_v25, %v2712_v26  ;;  %v2779_v31 = vor.u32 %v3034_v28, %v2776_v29  ;;  %v2568_v32 = vld [vmem:[#allocation7 + $0x18] sm:$0xf0] }
 0x18f   :  { %v2571_v49 = vor.u32 %v2982_v43, %v2568_v32 }
 0x191   :  { %1796 = vmatpush.bf16.msra.mxu0 %v2619_v33  ;;  %1809 = vmatpush.bf16.msra.mxu1 %v2683_v35  ;;  %v2998_v33 = vld [vmem:[#allocation7 + $0x10c] sm:$0xf]  ;;  %v2632_v35 = vld [vmem:[#allocation7 + $0x118] sm:$0xf0] }
 0x192   :  { %1822 = vmatpush.bf16.msra.mxu2 %v2747_v19  ;;  %1835 = vmatpush.bf16.msra.mxu3 %v2811_v46  ;;  %v2635_v36 = vor.u32 %v2998_v33, %v2632_v35  ;;  %v3014_v19 = vld [vmem:[#allocation7 + $0x20c] sm:$0xf] }
 0x193   :  { %v2699_v46 = vor.u32 %v3014_v19, %v2696_v44 }
 0x195   :  { %1797 = vmatpush.bf16.msra.mxu0 %v2611_v38  ;;  %1810 = vmatpush.bf16.msra.mxu1 %v2675_v39  ;;  %v2704_v38 = vld [vmem:[#allocation7 + $0x238] sm:$0xf0] }
 0x196   :  { %1823 = vmatpush.bf16.msra.mxu2 %v2739_v57  ;;  %1836 = vmatpush.bf16.msra.mxu3 %v2803_v60  ;;  %v2707_v39 = vor.u32 %v3016_v37, %v2704_v38  ;;  %v1192_v60 = vperm.slane %v309_v34, 2 }
 0x199   :  { %1798 = vmatpush.bf16.msra.mxu0 %v2603_v50  ;;  %1811 = vmatpush.bf16.msra.mxu1 %v2667_v52  ;;  %v1190_v50 = vperm.slane %v309_v34, 0 }
 0x19a   :  { %1824 = vmatpush.bf16.msra.mxu2 %v2731_v6  ;;  %1837 = vmatpush.bf16.msra.mxu3 %v2795_v8 }
 0x19d   :  { %1799 = vmatpush.bf16.msra.mxu0 %v2595_v63  ;;  %1812 = vmatpush.bf16.msra.mxu1 %v2659_v2 }
 0x19e   :  { %1825 = vmatpush.bf16.msra.mxu2 %v2723_v16  ;;  %1838 = vmatpush.bf16.msra.mxu3 %v2787_v20 }
 0x1a1   :  { %1800 = vmatpush.bf16.msra.mxu0 %v2587_v42  ;;  %1813 = vmatpush.bf16.msra.mxu1 %v2651_v12  ;;  %v310_v12 = vld [vmem:[#allocation8 + $0xa] sm:$0x3] }
 0x1a2   :  { %1826 = vmatpush.bf16.msra.mxu2 %v2715_v27  ;;  %1839 = vmatpush.bf16.msra.mxu3 %v2779_v31  ;;  %v1419_v13 = vperm.slane %v310_v12, 0  ;;  %v1420_v26 = vperm.slane %v310_v12, 1 }
 0x1a5   :  { %1801 = vmatpush.bf16.msra.mxu0 %v2579_v23  ;;  %1814 = vmatpush.bf16.msra.mxu1 %v2643_v30 }
 0x1a6   :  { %1827 = vmatpush.bf16.msra.mxu2 %v2707_v39  ;;  %1840 = vmatpush.bf16.msra.mxu3 %v2771_v41 }
 0x1a9   :  { %1802 = vmatpush.bf16.msra.mxu0 %v2571_v49  ;;  %1815 = vmatpush.bf16.msra.mxu1 %v2635_v36 }
 0x1aa   :  { %1828 = vmatpush.bf16.msra.mxu2 %v2699_v46  ;;  %1841 = vmatpush.bf16.msra.mxu3 %v2763_v48 }
 0x208   :  { %v1367_v52 = vpop.f32.mrf.mxu0  ;;  %v1380_v54 = vpop.f32.mrf.mxu1 }
 0x209   :  { %v1368_v55 = vadd.f32 %v1367_v52, %v1190_v50  ;;  %v1381_v56 = vadd.f32 %v1380_v54, %v1191_v51 }
 0x20b   :  { %v1410_v57 = vmax.f32 %v1368_v55, 0.0  ;;  %v1411_v59 = vmax.f32 %v1381_v56, 0.0 }
 0x20d   :  { %v1414_v62 = vpack.c.bf16 %v1410_v57, %v1410_v57  ;;  %v1415_v63 = vpack.c.bf16 %v1411_v59, %v1411_v59 }
 0x20f   :  { %v1393_v0 = vpop.f32.mrf.mxu2  ;;  %v1406_v1 = vpop.f32.mrf.mxu3  ;;  %1751 = vmatmul.bf16.vlgmr.msrb.gmra.mxu0 %v1414_v62  ;;  %1764 = vmatmul.bf16.vlgmr.msrb.gmra.mxu1 %v1415_v63 }
 0x210   :  { %v1394_v2 = vadd.f32 %v1393_v0, %v1192_v60  ;;  %v1407_v3 = vadd.f32 %v1406_v1, %v1193_v61  ;;  %v1369_v4 = vpop.f32.mrf.mxu0  ;;  %v1382_v5 = vpop.f32.mrf.mxu1 }
 0x212   :  { %v1412_v6 = vmax.f32 %v1394_v2, 0.0  ;;  %v1413_v7 = vmax.f32 %v1407_v3, 0.0 }
 0x214   :  { %v1416_v8 = vpack.c.bf16 %v1412_v6, %v1412_v6  ;;  %v1417_v9 = vpack.c.bf16 %v1413_v7, %v1413_v7 }
 0x216   :  { %1777 = vmatmul.bf16.vlgmr.msrb.gmra.mxu2 %v1416_v8  ;;  %1790 = vmatmul.bf16.vlgmr.msrb.gmra.mxu3 %v1417_v9 }
 0x217   :  { %v1395_v10 = vpop.f32.mrf.mxu2  ;;  %v1408_v58 = vpop.f32.mrf.mxu3 }
 0x21f   :  { %1803 = vmatmul.bf16.vlgmr.msra.gmra.mxu0 %v1414_v62  ;;  %1816 = vmatmul.bf16.vlgmr.msra.gmra.mxu1 %v1415_v63 }
 0x226   :  { %1829 = vmatmul.bf16.vlgmr.msra.gmra.mxu2 %v1416_v8  ;;  %1842 = vmatmul.bf16.vlgmr.msra.gmra.mxu3 %v1417_v9 }
 0x28c   :  { %v1752_v42 = vpop.f32.mrf.mxu0  ;;  %v1765_v11 = vpop.f32.mrf.mxu1 }
 0x28d   :  { %v1753_v14 = vadd.f32 %v1752_v42, %v1419_v13 }
 0x28f   :  { %v1766_v17 = vadd.f32 %v1765_v11, %v1753_v14 }
 0x294   :  { %v1754_v15 = vpop.f32.mrf.mxu0  ;;  %v1767_v16 = vpop.f32.mrf.mxu1 }
 0x299   :  { %v1778_v20 = vpop.f32.mrf.mxu2  ;;  %v1791_v18 = vpop.f32.mrf.mxu3 }
 0x29a   :  { %v1779_v21 = vadd.f32 %v1778_v20, %v1766_v17 }
 0x29c   :  { %v1792_v22 = vadd.f32 %v1791_v18, %v1779_v21  ;;  %v1804_v23 = vpop.f32.mrf.mxu0  ;;  %v1817_v24 = vpop.f32.mrf.mxu1 }
 0x29d   :  { %v1805_v28 = vadd.f32 %v1804_v23, %v1420_v26 }
 0x29e   :  { %v2820_v25 = vmul.f32 -1.442695, %v1792_v22 }
 0x29f   :  { %v1818_v33 = vadd.f32 %v1817_v24, %v1805_v28 }
 0x2a0   :  { %3056 = vpow2.f32 %v2820_v25 }
 0x2a1   :  { %v1780_v30 = vpop.f32.mrf.mxu2  ;;  %v1793_v27 = vpop.f32.mrf.mxu3 }
 0x2a4   :  { %v1806_v29 = vpop.f32.mrf.mxu0  ;;  %v1819_v43 = vpop.f32.mrf.mxu1 }
 0x2a6   :  { %v3057_v31 = vpop.eup %3056 }
 0x2a7   :  { %v1853_v32 = vadd.f32 1.0, %v3057_v31 }
 0x2a9   :  { %3058 = vrcp.f32 %v1853_v32  ;;  %v1830_v35 = vpop.f32.mrf.mxu2  ;;  %v1843_v49 = vpop.f32.mrf.mxu3  ;;  %v1866_v44 = vand.u32 2147483648, %v1853_v32  ;;  %v1864_v46 = vand.u32 2147483647, %v1853_v32  ;;  %vm1860_vm1 = vweird.f32 %v1853_v32 }
 0x2aa   :  { %v1831_v36 = vadd.f32 %v1830_v35, %v1818_v33 }
 0x2ab   :  { %v1867_v50 = vor.u32 1.1754944e-38, %v1866_v44  ;;  %vm1865_vm3 = vcmp.eq.f32.partialorder %v1864_v46, 8.507059e+37 }
 0x2ac   :  { %v1844_v37 = vadd.f32 %v1843_v49, %v1831_v36 }
 0x2ae   :  { %v2821_v38 = vmul.f32 -1.442695, %v1844_v37 }
 0x2af   :  { %v3059_v53 = vpop.eup %3058 }
 0x2b0   :  { %v1856_v39 = vmul.f32 %v3059_v53, %v1853_v32  ;;  %3060 = vpow2.f32 %v2821_v38  ;;  %vm1861_vm0 = vweird.f32 %v3059_v53 }
 0x2b1   :  { %v1832_v40 = vpop.f32.mrf.mxu2  ;;  %v1845_v41 = vpop.f32.mrf.mxu3  ;;  %vm1862_vm2 = vmor %vm1860_vm1, %vm1861_vm0 }
 0x2b2   :  { %v1857_v19 = vsub.f32 1.0, %v1856_v39 }
 0x2b4   :  { %v1858_v45 = vmul.f32 %v3059_v53, %v1857_v19 }
 0x2b6   :  { %v3061_v47 = vpop.eup %3060  ;;  %v1859_v48 = vadd.f32 %v3059_v53, %v1858_v45 }
 0x2b7   :  { %v1854_v34 = vadd.f32 1.0, %v3061_v47 }
 0x2b8   :  { %v1863_v51 = vsel %vm1862_vm2, %v3059_v53, %v1859_v48 }
 0x2b9   :  { %3062 = vrcp.f32 %v1854_v34  ;;  %v1868_v52 = vsel %vm1865_vm3, %v1867_v50, %v1863_v51  ;;  %v1881_v57 = vand.u32 2147483648, %v1854_v34  ;;  %v1879_v60 = vand.u32 2147483647, %v1854_v34 }
 0x2ba   :  { %1885 = vst [vmem:[#allocation10] sm:$0xff] %v1868_v52  ;;  %vm1875_vm5 = vweird.f32 %v1854_v34 }
 0x2bb   :  { %v1882_v62 = vor.u32 1.1754944e-38, %v1881_v57  ;;  %vm1880_vm7 = vcmp.eq.f32.partialorder %v1879_v60, 8.507059e+37 }
 0x2bf   :  { %v3063_v54 = vpop.eup %3062 }
 0x2c0   :  { %v1871_v55 = vmul.f32 %v3063_v54, %v1854_v34  ;;  %vm1876_vm4 = vweird.f32 %v3063_v54 }
 0x2c1   :  { %vm1877_vm6 = vmor %vm1875_vm5, %vm1876_vm4 }
 0x2c2   :  { %v1872_v56 = vsub.f32 1.0, %v1871_v55 }
 0x2c4   :  { %v1873_v59 = vmul.f32 %v3063_v54, %v1872_v56 }
 0x2c6   :  { %v1874_v61 = vadd.f32 %v3063_v54, %v1873_v59 }
 0x2c8   :  { %v1878_v63 = vsel %vm1877_vm6, %v3063_v54, %v1874_v61 }
 0x2c9   :  { %v1883_v0 = vsel %vm1880_vm7, %v1882_v62, %v1878_v63 }
 0x2ca   :  { %1886 = vst [vmem:[#allocation10 + $0x8] sm:$0xff] %v1883_v0 }
 0x2cb   :  { %1899 = dma.vmem_to_hbm [thread:$0]  %s1895_s16, 256, %s1897_s19, [#allocation4]  }
 0x2cc   :  { %3214 = dma.done.wait [#allocation4], 256  }
 0x2cd   :  { %3215 = vsyncadd [#allocation4], 4294967040 }
 0x2ce   :  { %3216 = dma.done.wait [#allocation12], 256  }
 0x2cf   :  { %3217 = vsyncadd [#allocation12], 4294967040 }
 0x2d0   :  { %1919 = vsyncpa [#allocation3], 1 }
 0x2d1   :  { %1920 = vsyncpa [#allocation6], 1 }
 0x2d2   :  { %1921 = vsyncpa [#allocation9], 1 }
 0x2d3   :  { %1922 = vsyncpa [#allocation4], 1 }
 0x2d4   :  { %1923 = vsyncpa [#allocation12], 1 }

</bundles_post_ra>
